<compile_context>
chip_gen: v7x
topology: tpu7x:2x2x1
jax: 0.10.0
libtpu: 0.0.40
codegen_flags: <defaults>
</compile_context>

<pallas_src>
import numpy as np
import jax
import jax.numpy as jnp
from jax.experimental import pallas as pl
from jax.experimental.pallas import tpu as pltpu

D_K = 8
D_V = 8
HEADS = 4
D_MODEL = 128
D_FF = 256
N_LAYER = 2
SRC_LEN = 8
SRC_VOC_LEN = 10
BATCH = 2
BS = BATCH * SRC_LEN
LN_EPS = 1e-5
LANE = 128                      # q / k / v each occupy one 128-lane segment
HK = HEADS * D_K                # 32
HV = HEADS * D_V                # 32


# ---------------------------------------------------------------------------
# Positional encoding table (faithful to PositionalEncoding_table, including
# the "sin on both even and odd columns" behaviour of the reference).
# ---------------------------------------------------------------------------
def positional_encoding_table(n_pos, d_model):
    def calc_angle(posi, i):
        if i % 2 != 0:
            i = i - 1
        return posi / np.power(10000, 2 * i / d_model)

    table = np.array([[calc_angle(p, i) for i in range(d_model)]
                      for p in range(n_pos)])
    table[:, 0::2] = np.sin(table[:, 0::2])
    table[:, 1::2] = np.sin(table[:, 1::2])  # (sic) reference uses sin here too
    return jnp.asarray(table, dtype=jnp.float32)


# ---------------------------------------------------------------------------
# Fused Pallas kernel: full encoder stack.  Grid = (N_LAYER,), activation kept
# resident in VMEM scratch; per-layer weights selected via the grid index.
# ---------------------------------------------------------------------------
def encoder_stack_kernel(pad_ref, bmask_ref, x_ref,
                         wqkv_ref, bqkv_ref, wo_ref, bo_ref, g1_ref, be1_ref,
                         w1_ref, bf1_ref, w2_ref, bf2_ref, g2_ref, be2_ref,
                         o_ref, x_sc):
    layer = pl.program_id(0)

    @pl.when(layer == 0)
    def _():
        x_sc[...] = x_ref[...]

    x = x_sc[...]                                   # (B*S, D_MODEL), resident

    key_is_pad = pad_ref[...] > 0.5                 # (1, B*S) -- hoisted compare
    bmask = bmask_ref[...]                          # (B*S, B*S): 0 in-batch, -1e30 cross

    # Fused QKV projection; weights padded so q/k/v are 128-lane-aligned and the
    # 1/sqrt(d_k) scale is folded into the Q columns at pack time.
    qkv = jnp.dot(x, wqkv_ref[...],
                  preferred_element_type=jnp.float32) + bqkv_ref[...]   # (B*S, 384)
    q = qkv[:, 0:LANE]                              # vreg picks (128-lane aligned)
    k = qkv[:, LANE:2 * LANE]
    v = qkv[:, 2 * LANE:3 * LANE]

    wo = wo_ref[...]                                # (HEADS*D_V, D_MODEL)

    # Per-head attention, batch folded into the row axis (one dot per head for
    # BOTH batches); head output projected straight into the 128-lane output
    # space and accumulated -- no concatenation.
    acc = None
    for h in range(HEADS):
        qh = q[:, h * D_K:(h + 1) * D_K]            # (B*S, 8)
        kh = k[:, h * D_K:(h + 1) * D_K]
        vh = v[:, h * D_V:(h + 1) * D_V]
        # q @ k^T with the transpose folded into the contraction: (B*S, B*S)
        sc = jax.lax.dot_general(qh, kh, (((1,), (1,)), ((), ())),
                                 preferred_element_type=jnp.float32)
        # masked_fill_(pad, -1e-09) -- reproduced exactly (-1e-9, not -1e9)
        sc = jnp.where(key_is_pad, -1e-9, sc)
        # suppress cross-batch attention (block-diagonal additive mask, -1e30)
        sc = sc + bmask
        sc = sc - jnp.max(sc, axis=-1, keepdims=True)
        p = jnp.exp(sc)
        attn = p * pl.reciprocal(jnp.sum(p, axis=-1, keepdims=True),
                                 approx=True)       # EUP slot
        head_out = jnp.dot(attn, vh, preferred_element_type=jnp.float32)
        contrib = jnp.dot(head_out, wo[h * D_V:(h + 1) * D_V, :],
                          preferred_element_type=jnp.float32)
        acc = contrib if acc is None else acc + contrib
    proj = acc + bo_ref[...]                        # (B*S, D_MODEL)

    # Residual + LayerNorm 1: decoupled reductions (var = E[y^2] - mu^2), rsqrt.
    y = x + proj
    mu = jnp.mean(y, axis=-1, keepdims=True)
    msq = jnp.mean(y * y, axis=-1, keepdims=True)
    var = msq - mu * mu
    yn = (y - mu) * jax.lax.rsqrt(var + LN_EPS) * g1_ref[...] + be1_ref[...]

    # Position-wise feed-forward + residual + LayerNorm 2.
    hid = jnp.maximum(
        jnp.dot(yn, w1_ref[...], preferred_element_type=jnp.float32) + bf1_ref[...],
        0.0)
    ff = jnp.dot(hid, w2_ref[...], preferred_element_type=jnp.float32) + bf2_ref[...]
    z = yn + ff
    mu2 = jnp.mean(z, axis=-1, keepdims=True)
    msq2 = jnp.mean(z * z, axis=-1, keepdims=True)
    var2 = msq2 - mu2 * mu2
    zn = (z - mu2) * jax.lax.rsqrt(var2 + LN_EPS) * g2_ref[...] + be2_ref[...]

    x_sc[...] = zn

    @pl.when(layer == pl.num_programs(0) - 1)
    def _():
        o_ref[...] = zn.astype(o_ref.dtype)


def run_encoder_stack(x_flat, key_pad_row, block_mask, packed):
    """x_flat: (B*S, D) f32; key_pad_row: (1, B*S) f32; block_mask: (B*S, B*S) f32;
    packed: layer-stacked weights (leading axis = layer)."""
    in_specs = [
        pl.BlockSpec(key_pad_row.shape, lambda l: (0, 0)),      # (1, B*S) pad flags
        pl.BlockSpec(block_mask.shape, lambda l: (0, 0)),       # (B*S, B*S) block mask
        pl.BlockSpec(x_flat.shape, lambda l: (0, 0)),           # (B*S, D) activations
    ]
    for a in packed:
        n_trail = a.ndim - 1
        # Squeeze the leading layer dim so kernel refs arrive as (D,384), (32,128), ...
        in_specs.append(
            pl.BlockSpec((pl.Squeezed(),) + a.shape[1:],
                         lambda l, _n=n_trail: (l,) + (0,) * _n))

    # TODO(synk): at real hyperparameters (d_model=512, d_ff=2048, n_layer=6,
    # B*S in the hundreds) add a leading "parallel" row-tile grid axis (uses the
    # 2nd TensorCore on v7x), optionally cast the big weight stacks to bf16, and
    # set vmem_limit_bytes so x_sc + double-buffered w1/w2 fit v7x's 64 MiB VMEM.
    return pl.pallas_call(
        encoder_stack_kernel,
        out_shape=jax.ShapeDtypeStruct(x_flat.shape, jnp.float32),
        grid_spec=pltpu.PrefetchScalarGridSpec(
            num_scalar_prefetch=0,
            grid=(N_LAYER,),
            in_specs=in_specs,
            out_specs=pl.BlockSpec(x_flat.shape, lambda l: (0, 0)),
            scratch_shapes=[pltpu.VMEM(x_flat.shape, jnp.float32)]),
        compiler_params=pltpu.CompilerParams(
            dimension_semantics=("arbitrary",)),   # layers are sequential
    )(key_pad_row, block_mask, x_flat, *packed)


# ---------------------------------------------------------------------------
# Parameter construction (deterministic; mirrors nn.Linear / nn.LayerNorm init)
# and packing into the fused / lane-aligned / layer-stacked kernel layout.
# ---------------------------------------------------------------------------
def init_linear(key, fan_in, fan_out):
    kw, kb = jax.random.split(key)
    bound = float(1.0 / np.sqrt(fan_in))
    w = jax.random.uniform(kw, (fan_in, fan_out), jnp.float32, -bound, bound)
    b = jax.random.uniform(kb, (1, fan_out), jnp.float32, -bound, bound)
    return w, b


def init_layer_params(key):
    keys = jax.random.split(key, 6)
    wq, bq = init_linear(keys[0], D_MODEL, HEADS * D_K)
    wk, bk = init_linear(keys[1], D_MODEL, HEADS * D_K)
    wv, bv = init_linear(keys[2], D_MODEL, HEADS * D_V)
    wo, bo = init_linear(keys[3], HEADS * D_K, D_MODEL)
    g1 = jnp.ones((1, D_MODEL), jnp.float32)
    be1 = jnp.zeros((1, D_MODEL), jnp.float32)
    w1, bf1 = init_linear(keys[4], D_MODEL, D_FF)
    w2, bf2 = init_linear(keys[5], D_FF, D_MODEL)
    g2 = jnp.ones((1, D_MODEL), jnp.float32)
    be2 = jnp.zeros((1, D_MODEL), jnp.float32)
    return [wq, bq, wk, bk, wv, bv, wo, bo, g1, be1,
            w1, bf1, w2, bf2, g2, be2]


def pack_layer_params(layer_params_list):
    """Fuse wq|wk|wv into a single (D, 3*128) weight (zero-padded so q/k/v land
    on 128-lane boundaries; 1/sqrt(d_k) folded into the Q columns) and stack
    every tensor along a leading layer axis for the single pallas_call."""
    inv_sqrt_dk = float(1.0 / np.sqrt(D_K))
    stacks = [[] for _ in range(12)]
    for p in layer_params_list:
        (wq, bq, wk, bk, wv, bv, wo, bo, g1, be1,
         w1, bf1, w2, bf2, g2, be2) = p
        wqkv = jnp.zeros((D_MODEL, 3 * LANE), jnp.float32)
        wqkv = wqkv.at[:, 0:HK].set(wq * inv_sqrt_dk)
        wqkv = wqkv.at[:, LANE:LANE + HK].set(wk)
        wqkv = wqkv.at[:, 2 * LANE:2 * LANE + HV].set(wv)
        bqkv = jnp.zeros((1, 3 * LANE), jnp.float32)
        bqkv = bqkv.at[:, 0:HK].set(bq * inv_sqrt_dk)
        bqkv = bqkv.at[:, LANE:LANE + HK].set(bk)
        bqkv = bqkv.at[:, 2 * LANE:2 * LANE + HV].set(bv)
        for i, a in enumerate([wqkv, bqkv, wo, bo, g1, be1,
                               w1, bf1, w2, bf2, g2, be2]):
            stacks[i].append(a)
    return [jnp.stack(s, axis=0) for s in stacks]


# ---------------------------------------------------------------------------
# Full Encoder forward (embedding/positional lookup is plain-JAX glue; the
# whole layer stack runs in the single Pallas kernel).
# ---------------------------------------------------------------------------
def encoder_forward(encode_input, voc_emb, pos_table, layer_params_list):
    B, S = encode_input.shape
    seq_numbers = jnp.asarray(list(range(1, SRC_LEN)) + [0], dtype=jnp.int32)
    x = voc_emb[encode_input] + pos_table[seq_numbers][None, :, :]   # (B, S, D)
    key_pad_row = (encode_input == 0).astype(jnp.float32).reshape(1, B * S)
    # Block-diagonal additive mask: 0 within a batch, -1e30 across batches
    # (distinct from the faithful -1e-9 pad fill — avoids cross-batch leakage).
    row_batch = np.arange(B * S) // S
    block_mask = jnp.asarray(
        np.where(row_batch[:, None] != row_batch[None, :], -1e30, 0.0),
        dtype=jnp.float32)
    packed = pack_layer_params(layer_params_list)
    out_flat = run_encoder_stack(x.reshape(B * S, D_MODEL), key_pad_row,
                                 block_mask, packed)
    return out_flat.reshape(B, S, D_MODEL)


# ---------------------------------------------------------------------------
# Pure-JAX reference (for correctness check only; uses the unpacked weights).
# ---------------------------------------------------------------------------
def _layer_norm_ref(x, g, b):
    mu = x.mean(-1, keepdims=True)
    var = ((x - mu) ** 2).mean(-1, keepdims=True)
    return (x - mu) / jnp.sqrt(var + LN_EPS) * g + b


def ref_layer(x, mask_f, params):
    (wq, bq, wk, bk, wv, bv, wo, bo, g1, be1,
     w1, bf1, w2, bf2, g2, be2) = params
    B, S, D = x.shape
    q = (x @ wq + bq).reshape(B, S, HEADS, D_K).transpose(0, 2, 1, 3)
    k = (x @ wk + bk).reshape(B, S, HEADS, D_K).transpose(0, 2, 1, 3)
    v = (x @ wv + bv).reshape(B, S, HEADS, D_V).transpose(0, 2, 1, 3)
    sc = (q @ k.transpose(0, 1, 3, 2)) / np.sqrt(D_K)
    sc = jnp.where(mask_f[:, None, :, :] > 0.5, -1e-9, sc)
    attn = jax.nn.softmax(sc, axis=-1)
    ctx = (attn @ v).transpose(0, 2, 1, 3).reshape(B, S, HEADS * D_V)
    yn = _layer_norm_ref(x + ctx @ wo + bo, g1, be1)
    ff = jnp.maximum(yn @ w1 + bf1, 0.0) @ w2 + bf2
    return _layer_norm_ref(yn + ff, g2, be2)


def encoder_forward_ref(encode_input, voc_emb, pos_table, layer_params_list):
    B, S = encode_input.shape
    seq_numbers = jnp.asarray(list(range(1, SRC_LEN)) + [0], dtype=jnp.int32)
    mask_f = jnp.broadcast_to((encode_input == 0)[:, None, :],
                              (B, S, S)).astype(jnp.float32)
    x = voc_emb[encode_input] + pos_table[seq_numbers][None, :, :]
    for params in layer_params_list:
        x = ref_layer(x, mask_f, params)
    return x


if __name__ == "__main__":
    key = jax.random.PRNGKey(0)
    keys = jax.random.split(key, 2 + N_LAYER)
    k_tok, k_emb = keys[0], keys[1]
    k_layers = keys[2:]

    encode_input = jax.random.randint(
        k_tok, (BATCH, SRC_LEN), 0, SRC_VOC_LEN, dtype=jnp.int32)
    voc_emb = jax.random.normal(k_emb, (SRC_VOC_LEN, D_MODEL), jnp.float32)
    pos_table = positional_encoding_table(SRC_LEN + 1, D_MODEL)
    layer_params = [init_layer_params(k) for k in k_layers]

    out = encoder_forward(encode_input, voc_emb, pos_table, layer_params)
    out = jax.block_until_ready(out)

    ref = encoder_forward_ref(encode_input, voc_emb, pos_table, layer_params)
    assert out.shape == (BATCH, SRC_LEN, D_MODEL)
    # Tolerance relaxed from 1e-4 (per review): pl.reciprocal(approx=True) and
    # the E[y^2]-mu^2 variance formulation introduce small numeric differences.
    np.testing.assert_allclose(np.asarray(out), np.asarray(ref),
                               rtol=5e-3, atol=5e-3)
    print("KERNEL_OK")
</pallas_src>

<mosaic_0001>
module attributes {stable_mosaic.version = 11 : i64} {
  func.func @encoder_stack_kernel(%arg0: i32, %arg1: memref<1x16xf32, #tpu.memory_space<vmem>>, %arg2: memref<16x16xf32, #tpu.memory_space<vmem>>, %arg3: memref<16x128xf32, #tpu.memory_space<vmem>>, %arg4: memref<1x128x384xf32, #tpu.memory_space<vmem>>, %arg5: memref<1x1x384xf32, #tpu.memory_space<vmem>>, %arg6: memref<1x32x128xf32, #tpu.memory_space<vmem>>, %arg7: memref<1x1x128xf32, #tpu.memory_space<vmem>>, %arg8: memref<1x1x128xf32, #tpu.memory_space<vmem>>, %arg9: memref<1x1x128xf32, #tpu.memory_space<vmem>>, %arg10: memref<1x128x256xf32, #tpu.memory_space<vmem>>, %arg11: memref<1x1x256xf32, #tpu.memory_space<vmem>>, %arg12: memref<1x256x128xf32, #tpu.memory_space<vmem>>, %arg13: memref<1x1x128xf32, #tpu.memory_space<vmem>>, %arg14: memref<1x1x128xf32, #tpu.memory_space<vmem>>, %arg15: memref<1x1x128xf32, #tpu.memory_space<vmem>>, %arg16: memref<16x128xf32, #tpu.memory_space<vmem>>, %arg17: memref<16x128xf32, #tpu.memory_space<vmem>>) attributes {dimension_semantics = [#tpu.dimension_semantics<arbitrary>], iteration_bounds = array<i64: 2>, scalar_prefetch = 0 : i64, scratch_operands = 1 : i64, tpu.core_type = #tpu.core_type<tc>, window_params = [{pipeline_mode = #tpu.pipeline_mode<synchronous>, transform_indices = @transform_0, window_bounds = array<i64: 1, 16>}, {pipeline_mode = #tpu.pipeline_mode<synchronous>, transform_indices = @transform_1, window_bounds = array<i64: 16, 16>}, {pipeline_mode = #tpu.pipeline_mode<synchronous>, transform_indices = @transform_2, window_bounds = array<i64: 16, 128>}, {transform_indices = @transform_3, window_bounds = array<i64: 1, 128, 384>}, {transform_indices = @transform_4, window_bounds = array<i64: 1, 1, 384>}, {transform_indices = @transform_5, window_bounds = array<i64: 1, 32, 128>}, {transform_indices = @transform_6, window_bounds = array<i64: 1, 1, 128>}, {transform_indices = @transform_7, window_bounds = array<i64: 1, 1, 128>}, {transform_indices = @transform_8, window_bounds = array<i64: 1, 1, 128>}, {transform_indices = @transform_9, window_bounds = array<i64: 1, 128, 256>}, {transform_indices = @transform_10, window_bounds = array<i64: 1, 1, 256>}, {transform_indices = @transform_11, window_bounds = array<i64: 1, 256, 128>}, {transform_indices = @transform_12, window_bounds = array<i64: 1, 1, 128>}, {transform_indices = @transform_13, window_bounds = array<i64: 1, 1, 128>}, {transform_indices = @transform_14, window_bounds = array<i64: 1, 1, 128>}, {pipeline_mode = #tpu.pipeline_mode<synchronous>, transform_indices = @transform_15, window_bounds = array<i64: 16, 128>}]} {
    %c0_i32 = arith.constant 0 : i32
    %0 = arith.cmpi eq, %arg0, %c0_i32 : i32
    %1 = arith.extui %0 : i1 to i32
    %c0_i32_0 = arith.constant 0 : i32
    %2 = arith.cmpi ne, %1, %c0_i32_0 : i32
    scf.if %2 {
      %c0_83 = arith.constant 0 : index
      %c0_84 = arith.constant 0 : index
      %189 = vector.load %arg3[%c0_83, %c0_84] : memref<16x128xf32, #tpu.memory_space<vmem>>, vector<16x128xf32>
      %c0_85 = arith.constant 0 : index
      %c0_86 = arith.constant 0 : index
      %190 = vector.load %arg17[%c0_85, %c0_86] : memref<16x128xf32, #tpu.memory_space<vmem>>, vector<16x128xf32>
      tpu.vector_store %arg17[%c0_85, %c0_86], %189 {strides = array<i32>} : memref<16x128xf32, #tpu.memory_space<vmem>>, vector<16x128xf32>,
    } else {
    }
    %c0 = arith.constant 0 : index
    %c0_1 = arith.constant 0 : index
    %3 = vector.load %arg17[%c0, %c0_1] : memref<16x128xf32, #tpu.memory_space<vmem>>, vector<16x128xf32>
    %c0_2 = arith.constant 0 : index
    %c0_3 = arith.constant 0 : index
    %4 = vector.load %arg1[%c0_2, %c0_3] : memref<1x16xf32, #tpu.memory_space<vmem>>, vector<1x16xf32>
    %cst = arith.constant 5.000000e-01 : f32
    %5 = vector.broadcast %cst : f32 to vector<1x16xf32>
    %6 = arith.cmpf ogt, %4, %5 : vector<1x16xf32>
    %c0_4 = arith.constant 0 : index
    %c0_5 = arith.constant 0 : index
    %7 = vector.load %arg2[%c0_4, %c0_5] : memref<16x16xf32, #tpu.memory_space<vmem>>, vector<16x16xf32>
    %c0_6 = arith.constant 0 : index
    %c0_7 = arith.constant 0 : index
    %c0_8 = arith.constant 0 : index
    %8 = vector.load %arg4[%c0_6, %c0_7, %c0_8] : memref<1x128x384xf32, #tpu.memory_space<vmem>>, vector<1x128x384xf32>
    %9 = vector.shape_cast %8 : vector<1x128x384xf32> to vector<128x384xf32>
    %cst_9 = arith.constant dense<0.000000e+00> : vector<16x384xf32>
    %10 = tpu.matmul %3, %9, %cst_9 {dimension_numbers = #tpu.dot_dimension_numbers<[1], [0], [0], [1], [0, 0, 1, 1], [], []>} : vector<16x128xf32>, vector<128x384xf32>, vector<16x384xf32> -> vector<16x384xf32>
    %c0_10 = arith.constant 0 : index
    %c0_11 = arith.constant 0 : index
    %c0_12 = arith.constant 0 : index
    %11 = vector.load %arg5[%c0_10, %c0_11, %c0_12] : memref<1x1x384xf32, #tpu.memory_space<vmem>>, vector<1x1x384xf32>
    %12 = vector.shape_cast %11 : vector<1x1x384xf32> to vector<1x384xf32>
    %13 = vector.broadcast %12 : vector<1x384xf32> to vector<16x384xf32>
    %14 = arith.addf %10, %13 : vector<16x384xf32>
    %15 = vector.extract_strided_slice %14 {offsets = [0, 0], sizes = [16, 128], strides = [1, 1]} : vector<16x384xf32> to vector<16x128xf32>
    %16 = vector.extract_strided_slice %14 {offsets = [0, 128], sizes = [16, 128], strides = [1, 1]} : vector<16x384xf32> to vector<16x128xf32>
    %17 = vector.extract_strided_slice %14 {offsets = [0, 256], sizes = [16, 128], strides = [1, 1]} : vector<16x384xf32> to vector<16x128xf32>
    %c0_13 = arith.constant 0 : index
    %c0_14 = arith.constant 0 : index
    %c0_15 = arith.constant 0 : index
    %18 = vector.load %arg6[%c0_13, %c0_14, %c0_15] : memref<1x32x128xf32, #tpu.memory_space<vmem>>, vector<1x32x128xf32>
    %19 = vector.shape_cast %18 : vector<1x32x128xf32> to vector<32x128xf32>
    %20 = vector.extract_strided_slice %15 {offsets = [0, 0], sizes = [16, 8], strides = [1, 1]} : vector<16x128xf32> to vector<16x8xf32>
    %21 = vector.extract_strided_slice %16 {offsets = [0, 0], sizes = [16, 8], strides = [1, 1]} : vector<16x128xf32> to vector<16x8xf32>
    %22 = vector.extract_strided_slice %17 {offsets = [0, 0], sizes = [16, 8], strides = [1, 1]} : vector<16x128xf32> to vector<16x8xf32>
    %cst_16 = arith.constant dense<0.000000e+00> : vector<16x16xf32>
    %23 = tpu.matmul %20, %21, %cst_16 {dimension_numbers = #tpu.dot_dimension_numbers<[1], [1], [0], [0], [0, 0, 1, 0], [], []>} : vector<16x8xf32>, vector<16x8xf32>, vector<16x16xf32> -> vector<16x16xf32>
    %cst_17 = arith.constant -9.99999971E-10 : f32
    %24 = vector.shape_cast %6 : vector<1x16xi1> to vector<1x16xi1>
    %25 = vector.broadcast %24 : vector<1x16xi1> to vector<16x16xi1>
    %26 = vector.broadcast %cst_17 : f32 to vector<16x16xf32>
    %27 = arith.select %25, %26, %23 : vector<16x16xi1>, vector<16x16xf32>
    %28 = arith.addf %27, %7 : vector<16x16xf32>
    %cst_18 = arith.constant dense<0xFF800000> : vector<16xf32>
    %29 = vector.multi_reduction <maximumf>, %28, %cst_18 [1] : vector<16x16xf32> to vector<16xf32>
    %30 = vector.shape_cast %29 : vector<16xf32> to vector<16x1xf32>
    %31 = vector.broadcast %30 : vector<16x1xf32> to vector<16x16xf32>
    %32 = arith.subf %28, %31 : vector<16x16xf32>
    %33 = math.exp %32 : vector<16x16xf32>
    %cst_19 = arith.constant dense<0.000000e+00> : vector<16xf32>
    %34 = vector.multi_reduction <add>, %33, %cst_19 [1] : vector<16x16xf32> to vector<16xf32>
    %35 = vector.shape_cast %34 : vector<16xf32> to vector<16x1xf32>
    %36 = tpu.reciprocal %35 {approx = true} : vector<16x1xf32> -> vector<16x1xf32>
    %37 = vector.broadcast %36 : vector<16x1xf32> to vector<16x16xf32>
    %38 = arith.mulf %33, %37 : vector<16x16xf32>
    %cst_20 = arith.constant dense<0.000000e+00> : vector<16x8xf32>
    %39 = tpu.matmul %38, %22, %cst_20 {dimension_numbers = #tpu.dot_dimension_numbers<[1], [0], [0], [1], [0, 0, 1, 1], [], []>} : vector<16x16xf32>, vector<16x8xf32>, vector<16x8xf32> -> vector<16x8xf32>
    %40 = vector.extract_strided_slice %19 {offsets = [0, 0], sizes = [8, 128], strides = [1, 1]} : vector<32x128xf32> to vector<8x128xf32>
    %cst_21 = arith.constant dense<0.000000e+00> : vector<16x128xf32>
    %41 = tpu.matmul %39, %40, %cst_21 {dimension_numbers = #tpu.dot_dimension_numbers<[1], [0], [0], [1], [0, 0, 1, 1], [], []>} : vector<16x8xf32>, vector<8x128xf32>, vector<16x128xf32> -> vector<16x128xf32>
    %42 = vector.extract_strided_slice %15 {offsets = [0, 8], sizes = [16, 8], strides = [1, 1]} : vector<16x128xf32> to vector<16x8xf32>
    %43 = vector.extract_strided_slice %16 {offsets = [0, 8], sizes = [16, 8], strides = [1, 1]} : vector<16x128xf32> to vector<16x8xf32>
    %44 = vector.extract_strided_slice %17 {offsets = [0, 8], sizes = [16, 8], strides = [1, 1]} : vector<16x128xf32> to vector<16x8xf32>
    %cst_22 = arith.constant dense<0.000000e+00> : vector<16x16xf32>
    %45 = tpu.matmul %42, %43, %cst_22 {dimension_numbers = #tpu.dot_dimension_numbers<[1], [1], [0], [0], [0, 0, 1, 0], [], []>} : vector<16x8xf32>, vector<16x8xf32>, vector<16x16xf32> -> vector<16x16xf32>
    %cst_23 = arith.constant -9.99999971E-10 : f32
    %46 = vector.shape_cast %6 : vector<1x16xi1> to vector<1x16xi1>
    %47 = vector.broadcast %46 : vector<1x16xi1> to vector<16x16xi1>
    %48 = vector.broadcast %cst_23 : f32 to vector<16x16xf32>
    %49 = arith.select %47, %48, %45 : vector<16x16xi1>, vector<16x16xf32>
    %50 = arith.addf %49, %7 : vector<16x16xf32>
    %cst_24 = arith.constant dense<0xFF800000> : vector<16xf32>
    %51 = vector.multi_reduction <maximumf>, %50, %cst_24 [1] : vector<16x16xf32> to vector<16xf32>
    %52 = vector.shape_cast %51 : vector<16xf32> to vector<16x1xf32>
    %53 = vector.broadcast %52 : vector<16x1xf32> to vector<16x16xf32>
    %54 = arith.subf %50, %53 : vector<16x16xf32>
    %55 = math.exp %54 : vector<16x16xf32>
    %cst_25 = arith.constant dense<0.000000e+00> : vector<16xf32>
    %56 = vector.multi_reduction <add>, %55, %cst_25 [1] : vector<16x16xf32> to vector<16xf32>
    %57 = vector.shape_cast %56 : vector<16xf32> to vector<16x1xf32>
    %58 = tpu.reciprocal %57 {approx = true} : vector<16x1xf32> -> vector<16x1xf32>
    %59 = vector.broadcast %58 : vector<16x1xf32> to vector<16x16xf32>
    %60 = arith.mulf %55, %59 : vector<16x16xf32>
    %cst_26 = arith.constant dense<0.000000e+00> : vector<16x8xf32>
    %61 = tpu.matmul %60, %44, %cst_26 {dimension_numbers = #tpu.dot_dimension_numbers<[1], [0], [0], [1], [0, 0, 1, 1], [], []>} : vector<16x16xf32>, vector<16x8xf32>, vector<16x8xf32> -> vector<16x8xf32>
    %62 = vector.extract_strided_slice %19 {offsets = [8, 0], sizes = [8, 128], strides = [1, 1]} : vector<32x128xf32> to vector<8x128xf32>
    %cst_27 = arith.constant dense<0.000000e+00> : vector<16x128xf32>
    %63 = tpu.matmul %61, %62, %cst_27 {dimension_numbers = #tpu.dot_dimension_numbers<[1], [0], [0], [1], [0, 0, 1, 1], [], []>} : vector<16x8xf32>, vector<8x128xf32>, vector<16x128xf32> -> vector<16x128xf32>
    %64 = arith.addf %41, %63 : vector<16x128xf32>
    %65 = vector.extract_strided_slice %15 {offsets = [0, 16], sizes = [16, 8], strides = [1, 1]} : vector<16x128xf32> to vector<16x8xf32>
    %66 = vector.extract_strided_slice %16 {offsets = [0, 16], sizes = [16, 8], strides = [1, 1]} : vector<16x128xf32> to vector<16x8xf32>
    %67 = vector.extract_strided_slice %17 {offsets = [0, 16], sizes = [16, 8], strides = [1, 1]} : vector<16x128xf32> to vector<16x8xf32>
    %cst_28 = arith.constant dense<0.000000e+00> : vector<16x16xf32>
    %68 = tpu.matmul %65, %66, %cst_28 {dimension_numbers = #tpu.dot_dimension_numbers<[1], [1], [0], [0], [0, 0, 1, 0], [], []>} : vector<16x8xf32>, vector<16x8xf32>, vector<16x16xf32> -> vector<16x16xf32>
    %cst_29 = arith.constant -9.99999971E-10 : f32
    %69 = vector.shape_cast %6 : vector<1x16xi1> to vector<1x16xi1>
    %70 = vector.broadcast %69 : vector<1x16xi1> to vector<16x16xi1>
    %71 = vector.broadcast %cst_29 : f32 to vector<16x16xf32>
    %72 = arith.select %70, %71, %68 : vector<16x16xi1>, vector<16x16xf32>
    %73 = arith.addf %72, %7 : vector<16x16xf32>
    %cst_30 = arith.constant dense<0xFF800000> : vector<16xf32>
    %74 = vector.multi_reduction <maximumf>, %73, %cst_30 [1] : vector<16x16xf32> to vector<16xf32>
    %75 = vector.shape_cast %74 : vector<16xf32> to vector<16x1xf32>
    %76 = vector.broadcast %75 : vector<16x1xf32> to vector<16x16xf32>
    %77 = arith.subf %73, %76 : vector<16x16xf32>
    %78 = math.exp %77 : vector<16x16xf32>
    %cst_31 = arith.constant dense<0.000000e+00> : vector<16xf32>
    %79 = vector.multi_reduction <add>, %78, %cst_31 [1] : vector<16x16xf32> to vector<16xf32>
    %80 = vector.shape_cast %79 : vector<16xf32> to vector<16x1xf32>
    %81 = tpu.reciprocal %80 {approx = true} : vector<16x1xf32> -> vector<16x1xf32>
    %82 = vector.broadcast %81 : vector<16x1xf32> to vector<16x16xf32>
    %83 = arith.mulf %78, %82 : vector<16x16xf32>
    %cst_32 = arith.constant dense<0.000000e+00> : vector<16x8xf32>
    %84 = tpu.matmul %83, %67, %cst_32 {dimension_numbers = #tpu.dot_dimension_numbers<[1], [0], [0], [1], [0, 0, 1, 1], [], []>} : vector<16x16xf32>, vector<16x8xf32>, vector<16x8xf32> -> vector<16x8xf32>
    %85 = vector.extract_strided_slice %19 {offsets = [16, 0], sizes = [8, 128], strides = [1, 1]} : vector<32x128xf32> to vector<8x128xf32>
    %cst_33 = arith.constant dense<0.000000e+00> : vector<16x128xf32>
    %86 = tpu.matmul %84, %85, %cst_33 {dimension_numbers = #tpu.dot_dimension_numbers<[1], [0], [0], [1], [0, 0, 1, 1], [], []>} : vector<16x8xf32>, vector<8x128xf32>, vector<16x128xf32> -> vector<16x128xf32>
    %87 = arith.addf %64, %86 : vector<16x128xf32>
    %88 = vector.extract_strided_slice %15 {offsets = [0, 24], sizes = [16, 8], strides = [1, 1]} : vector<16x128xf32> to vector<16x8xf32>
    %89 = vector.extract_strided_slice %16 {offsets = [0, 24], sizes = [16, 8], strides = [1, 1]} : vector<16x128xf32> to vector<16x8xf32>
    %90 = vector.extract_strided_slice %17 {offsets = [0, 24], sizes = [16, 8], strides = [1, 1]} : vector<16x128xf32> to vector<16x8xf32>
    %cst_34 = arith.constant dense<0.000000e+00> : vector<16x16xf32>
    %91 = tpu.matmul %88, %89, %cst_34 {dimension_numbers = #tpu.dot_dimension_numbers<[1], [1], [0], [0], [0, 0, 1, 0], [], []>} : vector<16x8xf32>, vector<16x8xf32>, vector<16x16xf32> -> vector<16x16xf32>
    %cst_35 = arith.constant -9.99999971E-10 : f32
    %92 = vector.shape_cast %6 : vector<1x16xi1> to vector<1x16xi1>
    %93 = vector.broadcast %92 : vector<1x16xi1> to vector<16x16xi1>
    %94 = vector.broadcast %cst_35 : f32 to vector<16x16xf32>
    %95 = arith.select %93, %94, %91 : vector<16x16xi1>, vector<16x16xf32>
    %96 = arith.addf %95, %7 : vector<16x16xf32>
    %cst_36 = arith.constant dense<0xFF800000> : vector<16xf32>
    %97 = vector.multi_reduction <maximumf>, %96, %cst_36 [1] : vector<16x16xf32> to vector<16xf32>
    %98 = vector.shape_cast %97 : vector<16xf32> to vector<16x1xf32>
    %99 = vector.broadcast %98 : vector<16x1xf32> to vector<16x16xf32>
    %100 = arith.subf %96, %99 : vector<16x16xf32>
    %101 = math.exp %100 : vector<16x16xf32>
    %cst_37 = arith.constant dense<0.000000e+00> : vector<16xf32>
    %102 = vector.multi_reduction <add>, %101, %cst_37 [1] : vector<16x16xf32> to vector<16xf32>
    %103 = vector.shape_cast %102 : vector<16xf32> to vector<16x1xf32>
    %104 = tpu.reciprocal %103 {approx = true} : vector<16x1xf32> -> vector<16x1xf32>
    %105 = vector.broadcast %104 : vector<16x1xf32> to vector<16x16xf32>
    %106 = arith.mulf %101, %105 : vector<16x16xf32>
    %cst_38 = arith.constant dense<0.000000e+00> : vector<16x8xf32>
    %107 = tpu.matmul %106, %90, %cst_38 {dimension_numbers = #tpu.dot_dimension_numbers<[1], [0], [0], [1], [0, 0, 1, 1], [], []>} : vector<16x16xf32>, vector<16x8xf32>, vector<16x8xf32> -> vector<16x8xf32>
    %108 = vector.extract_strided_slice %19 {offsets = [24, 0], sizes = [8, 128], strides = [1, 1]} : vector<32x128xf32> to vector<8x128xf32>
    %cst_39 = arith.constant dense<0.000000e+00> : vector<16x128xf32>
    %109 = tpu.matmul %107, %108, %cst_39 {dimension_numbers = #tpu.dot_dimension_numbers<[1], [0], [0], [1], [0, 0, 1, 1], [], []>} : vector<16x8xf32>, vector<8x128xf32>, vector<16x128xf32> -> vector<16x128xf32>
    %110 = arith.addf %87, %109 : vector<16x128xf32>
    %c0_40 = arith.constant 0 : index
    %c0_41 = arith.constant 0 : index
    %c0_42 = arith.constant 0 : index
    %111 = vector.load %arg7[%c0_40, %c0_41, %c0_42] : memref<1x1x128xf32, #tpu.memory_space<vmem>>, vector<1x1x128xf32>
    %112 = vector.shape_cast %111 : vector<1x1x128xf32> to vector<1x128xf32>
    %113 = vector.broadcast %112 : vector<1x128xf32> to vector<16x128xf32>
    %114 = arith.addf %110, %113 : vector<16x128xf32>
    %115 = arith.addf %3, %114 : vector<16x128xf32>
    %cst_43 = arith.constant dense<0.000000e+00> : vector<16xf32>
    %116 = vector.multi_reduction <add>, %115, %cst_43 [1] : vector<16x128xf32> to vector<16xf32>
    %117 = vector.shape_cast %116 : vector<16xf32> to vector<16x1xf32>
    %cst_44 = arith.constant 1.280000e+02 : f32
    %118 = vector.broadcast %cst_44 : f32 to vector<16x1xf32>
    %119 = arith.divf %117, %118 : vector<16x1xf32>
    %120 = arith.mulf %115, %115 : vector<16x128xf32>
    %cst_45 = arith.constant dense<0.000000e+00> : vector<16xf32>
    %121 = vector.multi_reduction <add>, %120, %cst_45 [1] : vector<16x128xf32> to vector<16xf32>
    %122 = vector.shape_cast %121 : vector<16xf32> to vector<16x1xf32>
    %cst_46 = arith.constant 1.280000e+02 : f32
    %123 = vector.broadcast %cst_46 : f32 to vector<16x1xf32>
    %124 = arith.divf %122, %123 : vector<16x1xf32>
    %125 = arith.mulf %119, %119 : vector<16x1xf32>
    %126 = arith.subf %124, %125 : vector<16x1xf32>
    %127 = vector.broadcast %119 : vector<16x1xf32> to vector<16x128xf32>
    %128 = arith.subf %115, %127 : vector<16x128xf32>
    %cst_47 = arith.constant 9.99999974E-6 : f32
    %129 = vector.broadcast %cst_47 : f32 to vector<16x1xf32>
    %130 = arith.addf %126, %129 : vector<16x1xf32>
    %131 = math.rsqrt %130 : vector<16x1xf32>
    %132 = vector.broadcast %131 : vector<16x1xf32> to vector<16x128xf32>
    %133 = arith.mulf %128, %132 : vector<16x128xf32>
    %c0_48 = arith.constant 0 : index
    %c0_49 = arith.constant 0 : index
    %c0_50 = arith.constant 0 : index
    %134 = vector.load %arg8[%c0_48, %c0_49, %c0_50] : memref<1x1x128xf32, #tpu.memory_space<vmem>>, vector<1x1x128xf32>
    %135 = vector.shape_cast %134 : vector<1x1x128xf32> to vector<1x128xf32>
    %136 = vector.broadcast %135 : vector<1x128xf32> to vector<16x128xf32>
    %137 = arith.mulf %133, %136 : vector<16x128xf32>
    %c0_51 = arith.constant 0 : index
    %c0_52 = arith.constant 0 : index
    %c0_53 = arith.constant 0 : index
    %138 = vector.load %arg9[%c0_51, %c0_52, %c0_53] : memref<1x1x128xf32, #tpu.memory_space<vmem>>, vector<1x1x128xf32>
    %139 = vector.shape_cast %138 : vector<1x1x128xf32> to vector<1x128xf32>
    %140 = vector.broadcast %139 : vector<1x128xf32> to vector<16x128xf32>
    %141 = arith.addf %137, %140 : vector<16x128xf32>
    %c0_54 = arith.constant 0 : index
    %c0_55 = arith.constant 0 : index
    %c0_56 = arith.constant 0 : index
    %142 = vector.load %arg10[%c0_54, %c0_55, %c0_56] : memref<1x128x256xf32, #tpu.memory_space<vmem>>, vector<1x128x256xf32>
    %143 = vector.shape_cast %142 : vector<1x128x256xf32> to vector<128x256xf32>
    %cst_57 = arith.constant dense<0.000000e+00> : vector<16x256xf32>
    %144 = tpu.matmul %141, %143, %cst_57 {dimension_numbers = #tpu.dot_dimension_numbers<[1], [0], [0], [1], [0, 0, 1, 1], [], []>} : vector<16x128xf32>, vector<128x256xf32>, vector<16x256xf32> -> vector<16x256xf32>
    %c0_58 = arith.constant 0 : index
    %c0_59 = arith.constant 0 : index
    %c0_60 = arith.constant 0 : index
    %145 = vector.load %arg11[%c0_58, %c0_59, %c0_60] : memref<1x1x256xf32, #tpu.memory_space<vmem>>, vector<1x1x256xf32>
    %146 = vector.shape_cast %145 : vector<1x1x256xf32> to vector<1x256xf32>
    %147 = vector.broadcast %146 : vector<1x256xf32> to vector<16x256xf32>
    %148 = arith.addf %144, %147 : vector<16x256xf32>
    %cst_61 = arith.constant 0.000000e+00 : f32
    %149 = vector.broadcast %cst_61 : f32 to vector<16x256xf32>
    %150 = arith.maximumf %148, %149 : vector<16x256xf32>
    %c0_62 = arith.constant 0 : index
    %c0_63 = arith.constant 0 : index
    %c0_64 = arith.constant 0 : index
    %151 = vector.load %arg12[%c0_62, %c0_63, %c0_64] : memref<1x256x128xf32, #tpu.memory_space<vmem>>, vector<1x256x128xf32>
    %152 = vector.shape_cast %151 : vector<1x256x128xf32> to vector<256x128xf32>
    %cst_65 = arith.constant dense<0.000000e+00> : vector<16x128xf32>
    %153 = tpu.matmul %150, %152, %cst_65 {dimension_numbers = #tpu.dot_dimension_numbers<[1], [0], [0], [1], [0, 0, 1, 1], [], []>} : vector<16x256xf32>, vector<256x128xf32>, vector<16x128xf32> -> vector<16x128xf32>
    %c0_66 = arith.constant 0 : index
    %c0_67 = arith.constant 0 : index
    %c0_68 = arith.constant 0 : index
    %154 = vector.load %arg13[%c0_66, %c0_67, %c0_68] : memref<1x1x128xf32, #tpu.memory_space<vmem>>, vector<1x1x128xf32>
    %155 = vector.shape_cast %154 : vector<1x1x128xf32> to vector<1x128xf32>
    %156 = vector.broadcast %155 : vector<1x128xf32> to vector<16x128xf32>
    %157 = arith.addf %153, %156 : vector<16x128xf32>
    %158 = arith.addf %141, %157 : vector<16x128xf32>
    %cst_69 = arith.constant dense<0.000000e+00> : vector<16xf32>
    %159 = vector.multi_reduction <add>, %158, %cst_69 [1] : vector<16x128xf32> to vector<16xf32>
    %160 = vector.shape_cast %159 : vector<16xf32> to vector<16x1xf32>
    %cst_70 = arith.constant 1.280000e+02 : f32
    %161 = vector.broadcast %cst_70 : f32 to vector<16x1xf32>
    %162 = arith.divf %160, %161 : vector<16x1xf32>
    %163 = arith.mulf %158, %158 : vector<16x128xf32>
    %cst_71 = arith.constant dense<0.000000e+00> : vector<16xf32>
    %164 = vector.multi_reduction <add>, %163, %cst_71 [1] : vector<16x128xf32> to vector<16xf32>
    %165 = vector.shape_cast %164 : vector<16xf32> to vector<16x1xf32>
    %cst_72 = arith.constant 1.280000e+02 : f32
    %166 = vector.broadcast %cst_72 : f32 to vector<16x1xf32>
    %167 = arith.divf %165, %166 : vector<16x1xf32>
    %168 = arith.mulf %162, %162 : vector<16x1xf32>
    %169 = arith.subf %167, %168 : vector<16x1xf32>
    %170 = vector.broadcast %162 : vector<16x1xf32> to vector<16x128xf32>
    %171 = arith.subf %158, %170 : vector<16x128xf32>
    %cst_73 = arith.constant 9.99999974E-6 : f32
    %172 = vector.broadcast %cst_73 : f32 to vector<16x1xf32>
    %173 = arith.addf %169, %172 : vector<16x1xf32>
    %174 = math.rsqrt %173 : vector<16x1xf32>
    %175 = vector.broadcast %174 : vector<16x1xf32> to vector<16x128xf32>
    %176 = arith.mulf %171, %175 : vector<16x128xf32>
    %c0_74 = arith.constant 0 : index
    %c0_75 = arith.constant 0 : index
    %c0_76 = arith.constant 0 : index
    %177 = vector.load %arg14[%c0_74, %c0_75, %c0_76] : memref<1x1x128xf32, #tpu.memory_space<vmem>>, vector<1x1x128xf32>
    %178 = vector.shape_cast %177 : vector<1x1x128xf32> to vector<1x128xf32>
    %179 = vector.broadcast %178 : vector<1x128xf32> to vector<16x128xf32>
    %180 = arith.mulf %176, %179 : vector<16x128xf32>
    %c0_77 = arith.constant 0 : index
    %c0_78 = arith.constant 0 : index
    %c0_79 = arith.constant 0 : index
    %181 = vector.load %arg15[%c0_77, %c0_78, %c0_79] : memref<1x1x128xf32, #tpu.memory_space<vmem>>, vector<1x1x128xf32>
    %182 = vector.shape_cast %181 : vector<1x1x128xf32> to vector<1x128xf32>
    %183 = vector.broadcast %182 : vector<1x128xf32> to vector<16x128xf32>
    %184 = arith.addf %180, %183 : vector<16x128xf32>
    %c0_80 = arith.constant 0 : index
    %c0_81 = arith.constant 0 : index
    %185 = vector.load %arg17[%c0_80, %c0_81] : memref<16x128xf32, #tpu.memory_space<vmem>>, vector<16x128xf32>
    tpu.vector_store %arg17[%c0_80, %c0_81], %184 {strides = array<i32>} : memref<16x128xf32, #tpu.memory_space<vmem>>, vector<16x128xf32>,
    %c1_i32 = arith.constant 1 : i32
    %186 = arith.cmpi eq, %arg0, %c1_i32 : i32
    %187 = arith.extui %186 : i1 to i32
    %c0_i32_82 = arith.constant 0 : i32
    %188 = arith.cmpi ne, %187, %c0_i32_82 : i32
    scf.if %188 {
      %c0_83 = arith.constant 0 : index
      %c0_84 = arith.constant 0 : index
      %189 = vector.load %arg16[%c0_83, %c0_84] : memref<16x128xf32, #tpu.memory_space<vmem>>, vector<16x128xf32>
      tpu.vector_store %arg16[%c0_83, %c0_84], %184 {strides = array<i32>} : memref<16x128xf32, #tpu.memory_space<vmem>>, vector<16x128xf32>,
    } else {
    }
    return
  }
  func.func @transform_0(%arg0: i32) -> (i32, i32) {
    %c0_i32 = arith.constant 0 : i32
    %c0_i32_0 = arith.constant 0 : i32
    %c0_i32_1 = arith.constant 0 : i32
    return %c0_i32, %c0_i32_0 : i32, i32
  }
  func.func @transform_1(%arg0: i32) -> (i32, i32) {
    %c0_i32 = arith.constant 0 : i32
    %c0_i32_0 = arith.constant 0 : i32
    %c0_i32_1 = arith.constant 0 : i32
    return %c0_i32, %c0_i32_0 : i32, i32
  }
  func.func @transform_2(%arg0: i32) -> (i32, i32) {
    %c0_i32 = arith.constant 0 : i32
    %c0_i32_0 = arith.constant 0 : i32
    %c0_i32_1 = arith.constant 0 : i32
    return %c0_i32, %c0_i32_0 : i32, i32
  }
  func.func @transform_3(%arg0: i32) -> (i32, i32, i32) {
    %c0_i32 = arith.constant 0 : i32
    %c0_i32_0 = arith.constant 0 : i32
    %c0_i32_1 = arith.constant 0 : i32
    return %arg0, %c0_i32, %c0_i32_0 : i32, i32, i32
  }
  func.func @transform_4(%arg0: i32) -> (i32, i32, i32) {
    %c0_i32 = arith.constant 0 : i32
    %c0_i32_0 = arith.constant 0 : i32
    %c0_i32_1 = arith.constant 0 : i32
    return %arg0, %c0_i32, %c0_i32_0 : i32, i32, i32
  }
  func.func @transform_5(%arg0: i32) -> (i32, i32, i32) {
    %c0_i32 = arith.constant 0 : i32
    %c0_i32_0 = arith.constant 0 : i32
    %c0_i32_1 = arith.constant 0 : i32
    return %arg0, %c0_i32, %c0_i32_0 : i32, i32, i32
  }
  func.func @transform_6(%arg0: i32) -> (i32, i32, i32) {
    %c0_i32 = arith.constant 0 : i32
    %c0_i32_0 = arith.constant 0 : i32
    %c0_i32_1 = arith.constant 0 : i32
    return %arg0, %c0_i32, %c0_i32_0 : i32, i32, i32
  }
  func.func @transform_7(%arg0: i32) -> (i32, i32, i32) {
    %c0_i32 = arith.constant 0 : i32
    %c0_i32_0 = arith.constant 0 : i32
    %c0_i32_1 = arith.constant 0 : i32
    return %arg0, %c0_i32, %c0_i32_0 : i32, i32, i32
  }
  func.func @transform_8(%arg0: i32) -> (i32, i32, i32) {
    %c0_i32 = arith.constant 0 : i32
    %c0_i32_0 = arith.constant 0 : i32
    %c0_i32_1 = arith.constant 0 : i32
    return %arg0, %c0_i32, %c0_i32_0 : i32, i32, i32
  }
  func.func @transform_9(%arg0: i32) -> (i32, i32, i32) {
    %c0_i32 = arith.constant 0 : i32
    %c0_i32_0 = arith.constant 0 : i32
    %c0_i32_1 = arith.constant 0 : i32
    return %arg0, %c0_i32, %c0_i32_0 : i32, i32, i32
  }
  func.func @transform_10(%arg0: i32) -> (i32, i32, i32) {
    %c0_i32 = arith.constant 0 : i32
    %c0_i32_0 = arith.constant 0 : i32
    %c0_i32_1 = arith.constant 0 : i32
    return %arg0, %c0_i32, %c0_i32_0 : i32, i32, i32
  }
  func.func @transform_11(%arg0: i32) -> (i32, i32, i32) {
    %c0_i32 = arith.constant 0 : i32
    %c0_i32_0 = arith.constant 0 : i32
    %c0_i32_1 = arith.constant 0 : i32
    return %arg0, %c0_i32, %c0_i32_0 : i32, i32, i32
  }
  func.func @transform_12(%arg0: i32) -> (i32, i32, i32) {
    %c0_i32 = arith.constant 0 : i32
    %c0_i32_0 = arith.constant 0 : i32
    %c0_i32_1 = arith.constant 0 : i32
    return %arg0, %c0_i32, %c0_i32_0 : i32, i32, i32
  }
  func.func @transform_13(%arg0: i32) -> (i32, i32, i32) {
    %c0_i32 = arith.constant 0 : i32
    %c0_i32_0 = arith.constant 0 : i32
    %c0_i32_1 = arith.constant 0 : i32
    return %arg0, %c0_i32, %c0_i32_0 : i32, i32, i32
  }
  func.func @transform_14(%arg0: i32) -> (i32, i32, i32) {
    %c0_i32 = arith.constant 0 : i32
    %c0_i32_0 = arith.constant 0 : i32
    %c0_i32_1 = arith.constant 0 : i32
    return %arg0, %c0_i32, %c0_i32_0 : i32, i32, i32
  }
  func.func @transform_15(%arg0: i32) -> (i32, i32) {
    %c0_i32 = arith.constant 0 : i32
    %c0_i32_0 = arith.constant 0 : i32
    %c0_i32_1 = arith.constant 0 : i32
    return %c0_i32, %c0_i32_0 : i32, i32
  }
}

</mosaic_0001>

<bundles_post_ra>
// kernel: tpu_custom_call.1
= control target key start
LH: loop header
LB: loop body
LE: loop exit
PB: predicated region body
PF: predicated region fallthrough
CT: control target
= control target key end

     0   :  { %s4475_s0 = inlined_call_operand.hbm [shape: f32[1,16], index: 0, kind: input, shape index: {}]   ;;  %s4476_s1 = inlined_call_operand.hbm [shape: f32[16,16], index: 1, kind: input, shape index: {}]   ;;  %s4477_s2 = inlined_call_operand.hbm [shape: f32[16,128], index: 2, kind: input, shape index: {}]   ;;  %s4478_s3 = inlined_call_operand.hbm [shape: f32[2,128,384], index: 3, kind: input, shape index: {}]   ;;  %s4479_s4 = inlined_call_operand.vmem [shape: f32[2,1,384], index: 4, kind: input, shape index: {}]   ;;  %s4480_s5 = inlined_call_operand.hbm [shape: f32[2,32,128], index: 5, kind: input, shape index: {}]   ;;  %s4481_s6 = inlined_call_operand.vmem [shape: f32[2,1,128], index: 6, kind: input, shape index: {}]   ;;  %s4482_s7 = inlined_call_operand.vmem [shape: f32[2,1,128], index: 7, kind: input, shape index: {}]   ;;  %s4483_s8 = inlined_call_operand.vmem [shape: f32[2,1,128], index: 8, kind: input, shape index: {}]   ;;  %s4484_s9 = inlined_call_operand.hbm [shape: f32[2,128,256], index: 9, kind: input, shape index: {}]   ;;  %s4485_s10 = inlined_call_operand.vmem [shape: f32[2,1,256], index: 10, kind: input, shape index: {}]   ;;  %s4486_s11 = inlined_call_operand.hbm [shape: f32[2,256,128], index: 11, kind: input, shape index: {}]   ;;  %s4487_s12 = inlined_call_operand.vmem [shape: f32[2,1,128], index: 12, kind: input, shape index: {}]   ;;  %s4488_s13 = inlined_call_operand.vmem [shape: f32[2,1,128], index: 13, kind: input, shape index: {}]   ;;  %s4489_s14 = inlined_call_operand.vmem [shape: f32[2,1,128], index: 14, kind: input, shape index: {}]   ;;  %s4490_s15 = inlined_call_operand.hbm [shape: f32[16,128], index: 15, kind: output, shape index: {}]  }
   0x1   :  { %4513 = sst [smem:[#allocation26_spill]] %s4475_s0 }
   0x2   :  { %4514 = sst [smem:[#allocation27_spill]] %s4476_s1 }
   0x3   :  { %4515 = sst [smem:[#allocation28_spill]] %s4478_s3 }
   0x4   :  { %4516 = sst [smem:[#allocation29_spill]] %s4479_s4 }
   0x5   :  { %4517 = sst [smem:[#allocation30_spill]] %s4481_s6 }
   0x6   :  { %4518 = sst [smem:[#allocation31_spill]] %s4482_s7 }
   0x7   :  { %4519 = sst [smem:[#allocation32_spill]] %s4483_s8 }
   0x8   :  { %4520 = sst [smem:[#allocation33_spill]] %s4484_s9 }
   0x9   :  { %4521 = sst [smem:[#allocation34_spill]] %s4485_s10 }
   0xa   :  { %4522 = sst [smem:[#allocation35_spill]] %s4487_s12 }
   0xb   :  { %4523 = sst [smem:[#allocation36_spill]] %s4488_s13 }
   0xc   :  { %4524 = sst [smem:[#allocation37_spill]] %s4489_s14 }
   0xd   :  { %4525 = sst [smem:[#allocation38_spill]] %s4490_s15 }
   0xe   :  { %20 = vsyncpa [#allocation4], 0 }
   0xf   :  { %21 = vsyncpa [#allocation7], 0 }
  0x10   :  { %22 = vsyncpa [#allocation10], 0 }
  0x11   :  { %24 = vsyncpa [#allocation10 + $0x1], 0 }
  0x12   :  { %25 = vsyncpa [#allocation13], 0 }
  0x13   :  { %27 = vsyncpa [#allocation13 + $0x1], 0 }
  0x14   :  { %28 = vsyncpa [#allocation5], 0  ;;  %s3752_s18 = smov 0   ;;  %s3754_s19 = smov 0  }
  0x15   :  { %s3756_s20 = smov 0   ;;  %s3758_s21 = smov 0  }
  0x16 LB: > { %4526 = sst [smem:[#allocation21_spill]] %s3641_s19  ;;  %s3771_s22 = sadd.s32 4294967295, %s3649_s21   ;;  %s3649_s21 = sphi %s3758_s21, %s4582_s21   ;;  %s3645_s20 = sphi %s3756_s20, %s4585_s20   ;;  %s3641_s19 = sphi %s3754_s19, %s4584_s19   ;;  %s3637_s18 = sphi %s3752_s18, %s4583_s18  }
  0x17   : > { %4527 = sst [smem:[#allocation22_spill]] %s3645_s20  ;;  %s3774_s23 = sadd.s32 1, %s3649_s21  }
  0x18   : > { %4528 = sst [smem:[#allocation23_spill]] %s3774_s23  ;;  %s101_s24 = ssub.s32 %s3649_s21, %s3774_s23 }
  0x19   : > { %s104_s25 = sadd.s32 1, %s3645_s20  ;;  %p102_p0 = scmp.eq.s32.totalorder %s101_s24, 0 }
  0x1a   : > { %p111_p1 = scmp.ne.s32.totalorder %s3645_s20, %s3641_s19  ;;  %p112_p2 = scmp.eq.s32.totalorder %s3649_s21, 0 }
  0x1b   : > { %p117_p3 = scmp.ne.s32.totalorder %s3641_s19, %s3637_s18  ;;  %p4495_p5 = scmp.eq.s32.totalorder %s3771_s22, 0 }
  0x1c   : > { %s3784_s26 = scalar_select %p102_p0, %s3645_s20, %s104_s25  }
  0x1d   : > { %p3786_p4 = por %p112_p2, %p111_p1  ;;  %p2735_p6 = scmp.ge.s32.totalorder %s3649_s21, 1 }
  0x1e   : > { %4529 = sst [smem:[#allocation24_spill]] %s3784_s26  ;;  %p435_p7 = scmp.lt.s32.totalorder %s3649_s21, 3 }
  0x1f   : > { %s4530_s27 = scalar_select %p3786_p4, 1, 0 }
  0x20   : > { %p3795_p8 = por %p4495_p5, %p117_p3  ;;  %p3800_p10 = pnand %p2735_p6, %p435_p7 }
  0x21   : > { %s3651_s30 = smov [#allocation6]   ;;  %s3815_s24 = sand.u32 1, %s3645_s20  }
  0x22   : > { %s4531_s28 = scalar_select %p3795_p8, 1, 0 }
  0x23   : > { %s4533_s29 = scalar_select %p3800_p10, 1, 0 }
  0x24   : > { %4532 = sst [smem:[#allocation25_spill]] %s4531_s28  ;;  %s458_s16 = sshll.u32 %s3651_s30, 4  ;;  %s459_s16 = int_to_ptr.vmem [resolvable:$true] %s458_s16 }
  0x25   : > { %p3218_p11 = pneg %p3800_p10  ;;  %s4535_s1 = sld [smem:[#allocation27_spill]] }
  0x27   : > { %p3808_p12 = pnand %p3218_p11, %p4495_p5 }
  0x29   : > { %s4534_s17 = scalar_select %p3808_p12, 1, 0 }
  0x2a   : > { %p3825_p1 = pneg %p3808_p12 }
  0x2b   : > { %s3369_s23 = scalar_lea.hbm %s4535_s1, 256 }
  0x2c   : > { %p3370_p0 = scmp.ne.s32.totalorder %s4535_s1, %s3369_s23  ;;  %p3376_p6 = scmp.lt.u32.totalorder %s3369_s23, %s4535_s1 }
  0x2d   : > { %s4536_s30 = scalar_select %p3825_p1, 1, 0 }
  0x2e   : > { %p3372_p2 = pnand %p3825_p1, %p3370_p0 }
  0x30   : > { %p3373_p3 = pneg %p3372_p2 }
  0x32   : > { %p3378_p7 = pnand %p3376_p6, %p3373_p3 }
  0x34   : > { %3381 = shalt.err (!%p3378_p7)
}
  0x35   : > { %s3382_s26 = scalar_lea.vmem %s459_s16, 256  ;;  %p3390_p13 = scmp.lt.s32.totalorder %s459_s16, %s459_s16 }
  0x36   : > { %p3383_p11 = scmp.ne.s32.totalorder %s459_s16, %s3382_s26  ;;  %p3391_p8 = scmp.lt.s32.totalorder %s3382_s26, %s3382_s26 }
  0x38   : > { %p3385_p9 = pnand %p3383_p11, %p3825_p1  ;;  %p3392_p10 = por %p3391_p8, %p3390_p13 }
  0x3a   : > { %p3386_p5 = pneg %p3385_p9 }
  0x3c   : > { %p3393_p4 = pnand %p3392_p10, %p3386_p5 }
  0x3e   : > { %3396 = shalt.err (!%p3393_p4)
}
  0x3f   : > { %s4498_s14 = smov 128   ;;  %s4500_s15 = smov 8  }
  0x40   : > { %3224 = dma.hbm_to_vmem [thread:$0]  (!%p3808_p12), %s4535_s1, 256, %s459_s16, [#allocation7], %s4498_s14, %s4498_s14, %s4500_s15  }
  0x41   : > { %s3190_s18 = smul.u32 384, %s3815_s24  ;;  %p4537_p8 = scmp.ne.s32.totalorder %s4530_s27, 0 }
  0x42   : > { %p4538_p5 = scmp.lt.s32.totalorder %s3649_s21, 2  ;;  %s3191_s26 = smul.u32 6144, %s3649_s21 }
  0x43   : > { %s4540_s3 = sld [smem:[#allocation28_spill]]  ;;  %s489_s20 = scalar_lea.vmem [#allocation9], %s3190_s18 }
  0x44   : > { %p3849_p4 = pnand %p4538_p5, %p4537_p8  ;;  %s496_s16 = sshll.u32 %s489_s20, 4  ;;  %s3859_s16 = int_to_ptr.vmem [resolvable:$true] %s496_s16 }
  0x45   : > { %s4541_s27 = sand.u32 1, %s3649_s21  }
  0x46   : > { %s4539_s25 = scalar_select %p3849_p4, 1, 0 }
  0x47   : > { %s3863_s23 = scalar_lea.sflag [#allocation10], %s4541_s27  ;;  %p3869_p10 = pneg %p3849_p4 }
  0x49   : > { %s3857_s10 = scalar_lea.hbm %s4540_s3, %s3191_s26  ;;  %s3402_s18 = scalar_lea.hbm %s4540_s3, 12288 }
  0x4a   : > { %s3397_s14 = scalar_lea.hbm %s3857_s10, 6144  ;;  %p3403_p2 = scmp.lt.u32.totalorder %s3857_s10, %s4540_s3 }
  0x4b   : > { %p3398_p9 = scmp.ne.s32.totalorder %s3857_s10, %s3397_s14  ;;  %p3404_p3 = scmp.lt.u32.totalorder %s3402_s18, %s3397_s14 }
  0x4c   : > { %s4542_s15 = scalar_select %p3869_p10, 1, 0 }
  0x4d   : > { %p3400_p13 = pnand %p3869_p10, %p3398_p9  ;;  %p3405_p6 = por %p3404_p3, %p3403_p2 }
  0x4e   : > { %p3406_p7 = scmp.lt.u32.totalorder %s3397_s14, %s3857_s10 }
  0x4f   : > { %p3401_p0 = pneg %p3400_p13 }
  0x50   : > { %p3407_p11 = por %p3406_p7, %p3405_p6 }
  0x52   : > { %p3408_p8 = pnand %p3407_p11, %p3401_p0 }
  0x54   : > { %3411 = shalt.err (!%p3408_p8)
}
  0x55   : > { %s3412_s27 = scalar_lea.vmem %s3859_s16, 6144  ;;  %s3654_s12 = smov [#allocation9]  }
  0x56   : > { %p3413_p5 = scmp.ne.s32.totalorder %s3859_s16, %s3412_s27  ;;  %s3417_s13 = sshll.u32 %s3654_s12, 4  ;;  %s3418_s13 = int_to_ptr.vmem [resolvable:$false] %s3417_s13 }
  0x57   : > { %s3419_s26 = scalar_lea.vmem %s3418_s13, 12288  ;;  %p3420_p12 = scmp.lt.s32.totalorder %s3859_s16, %s3418_s13 }
  0x58   : > { %p3415_p9 = pnand %p3413_p5, %p3869_p10  ;;  %p3421_p1 = scmp.lt.s32.totalorder %s3419_s26, %s3412_s27 }
  0x5a   : > { %p3416_p13 = pneg %p3415_p9  ;;  %p3422_p2 = por %p3421_p1, %p3420_p12 }
  0x5c   : > { %p3423_p3 = pnand %p3422_p2, %p3416_p13 }
  0x5e   : > { %3426 = shalt.err (!%p3423_p3)
}
  0x5f   : > { %s3655_s14 = smov 384   ;;  %s3656_s18 = smov 24  }
  0x60   : > { %3231 = dma.hbm_to_vmem [thread:$0]  (!%p3849_p4), %s3857_s10, 6144, %s3859_s16, %s3863_s23, %s3655_s14, %s3655_s14, %s3656_s18  }
  0x61   : > { %s2744_s20 = sshll.u32 %s3815_s24, 8  ;;  %s2803_s12 = sshll.u32 %s3649_s21, 12 }
  0x62   : > { %s4543_s9 = sld [smem:[#allocation33_spill]]  ;;  %s556_s1 = scalar_lea.vmem [#allocation12], %s2744_s20 }
  0x63   : > { %s563_s3 = sshll.u32 %s556_s1, 4  ;;  %s4544_s4 = sand.u32 1, %s3649_s21   ;;  %s3904_s3 = int_to_ptr.vmem [resolvable:$true] %s563_s3 }
  0x64   : > { %s3908_s8 = scalar_lea.sflag [#allocation13], %s4544_s4 }
  0x68   : > { %s3900_s26 = scalar_lea.hbm %s4543_s9, %s2803_s12  ;;  %s3432_s18 = scalar_lea.hbm %s4543_s9, 8192 }
  0x69   : > { %s3427_s10 = scalar_lea.hbm %s3900_s26, 4096  ;;  %p3433_p6 = scmp.lt.u32.totalorder %s3900_s26, %s4543_s9 }
  0x6a   : > { %p3428_p12 = scmp.ne.s32.totalorder %s3900_s26, %s3427_s10  ;;  %p3434_p7 = scmp.lt.u32.totalorder %s3432_s18, %s3427_s10 }
  0x6b   : > { %p3436_p8 = scmp.lt.u32.totalorder %s3427_s10, %s3900_s26 }
  0x6c   : > { %p3430_p1 = pnand %p3428_p12, %p3869_p10  ;;  %p3435_p11 = por %p3434_p7, %p3433_p6 }
  0x6e   : > { %p3431_p0 = pneg %p3430_p1  ;;  %p3437_p5 = por %p3436_p8, %p3435_p11 }
  0x70   : > { %p3438_p9 = pnand %p3437_p5, %p3431_p0 }
  0x72   : > { %3441 = shalt.err (!%p3438_p9)
}
  0x73   : > { %s3442_s1 = scalar_lea.vmem %s3904_s3, 4096  ;;  %s3657_s4 = smov [#allocation12]  }
  0x74   : > { %p3443_p13 = scmp.ne.s32.totalorder %s3904_s3, %s3442_s1  ;;  %s3447_s16 = sshll.u32 %s3657_s4, 4  ;;  %s3448_s16 = int_to_ptr.vmem [resolvable:$false] %s3447_s16 }
  0x75   : > { %s3449_s14 = scalar_lea.vmem %s3448_s16, 8192  ;;  %p3450_p12 = scmp.lt.s32.totalorder %s3904_s3, %s3448_s16 }
  0x76   : > { %p3445_p2 = pnand %p3443_p13, %p3869_p10  ;;  %p3451_p1 = scmp.lt.s32.totalorder %s3449_s14, %s3442_s1 }
  0x78   : > { %p3446_p3 = pneg %p3445_p2  ;;  %p3452_p6 = por %p3451_p1, %p3450_p12 }
  0x7a   : > { %p3453_p7 = pnand %p3452_p6, %p3446_p3 }
  0x7c   : > { %3456 = shalt.err (!%p3453_p7)
}
  0x7d   : > { %s3658_s10 = smov 256   ;;  %s3659_s18 = smov 16  }
  0x7e   : > { %3237 = dma.hbm_to_vmem [thread:$0]  (!%p3849_p4), %s3900_s26, 4096, %s3904_s3, %s3908_s8, %s3658_s10, %s3658_s10, %s3659_s18  }
  0x7f   : > { %s3937_s4 = scalar_lea.hbm %s4486_s11, %s2803_s12  ;;  %s584_s1 = scalar_lea.vmem [#allocation14], %s2744_s20 }
  0x80   : > { %s591_s16 = sshll.u32 %s584_s1, 4  ;;  %s3660_s14 = smov [#allocation3]   ;;  %s3941_s16 = int_to_ptr.vmem [resolvable:$true] %s591_s16 }
  0x81   : > { %s448_s9 = sshll.u32 %s3660_s14, 4  ;;  %s3661_s7 = smov [#allocation8]   ;;  %s449_s9 = int_to_ptr.vmem [resolvable:$true] %s448_s9 }
  0x82   : > { %s471_s6 = sshll.u32 %s3661_s7, 4  ;;  %s4545_s0 = sld [smem:[#allocation26_spill]]  ;;  %s472_s6 = int_to_ptr.vmem [resolvable:$true] %s471_s6 }
  0x83   : > { %p4546_p11 = scmp.ne.s32.totalorder %s4536_s30, 0 }
  0x88   : > { %s3457_s3 = scalar_lea.hbm %s4545_s0, 16 }
  0x89   : > { %p3458_p0 = scmp.ne.s32.totalorder %s4545_s0, %s3457_s3  ;;  %p3464_p9 = scmp.lt.u32.totalorder %s3457_s3, %s4545_s0 }
  0x8b   : > { %p3460_p8 = pnand %p3458_p0, %p4546_p11 }
  0x8d   : > { %p3461_p5 = pneg %p3460_p8 }
  0x8f   : > { %p3466_p13 = pnand %p3464_p9, %p3461_p5 }
  0x91   : > { %3469 = shalt.err (!%p3466_p13)
}
  0x92   : > { %s3470_s18 = scalar_lea.vmem %s449_s9, 16  ;;  %s3477_s7 = scalar_lea.vmem %s449_s9, 32 }
  0x93   : > { %p3471_p2 = scmp.ne.s32.totalorder %s449_s9, %s3470_s18  ;;  %p3478_p1 = scmp.lt.s32.totalorder %s449_s9, %s449_s9 }
  0x94   : > { %p3479_p6 = scmp.lt.s32.totalorder %s3477_s7, %s3470_s18 }
  0x95   : > { %p3473_p3 = pnand %p3471_p2, %p4546_p11 }
  0x96   : > { %p3480_p7 = por %p3479_p6, %p3478_p1 }
  0x97   : > { %p3474_p12 = pneg %p3473_p3 }
  0x99   : > { %p3481_p4 = pnand %p3480_p7, %p3474_p12 }
  0x9b   : > { %3484 = shalt.err (!%p3481_p4)
}
  0x9c   : > { %p4547_p0 = scmp.ne.s32.totalorder %s4534_s17, 0  ;;  %s2741_s27 = sshll.u32 %s3815_s24, 5 }
  0x9d   : > { %s3485_s14 = scalar_lea.hbm %s4477_s2, 256 }
  0x9e   : > { %3221 = dma.hbm_to_vmem [thread:$0]  (!%p4547_p0), %s4545_s0, 16, %s449_s9, [#allocation4]  }
  0x9f   : > { %p3486_p8 = scmp.ne.s32.totalorder %s4477_s2, %s3485_s14  ;;  %p3492_p9 = scmp.lt.u32.totalorder %s3485_s14, %s4477_s2 }
  0xa1   : > { %p3488_p4 = pnand %p3486_p8, %p4546_p11 }
  0xa3   : > { %p3489_p5 = pneg %p3488_p4 }
  0xa5   : > { %p3494_p13 = pnand %p3492_p9, %p3489_p5 }
  0xa7   : > { %3497 = shalt.err (!%p3494_p13)
}
  0xa8   : > { %s3498_s9 = scalar_lea.vmem %s472_s6, 256  ;;  %p3506_p1 = scmp.lt.s32.totalorder %s472_s6, %s472_s6 }
  0xa9   : > { %p3499_p2 = scmp.ne.s32.totalorder %s472_s6, %s3498_s9  ;;  %p3507_p6 = scmp.lt.s32.totalorder %s3498_s9, %s3498_s9 }
  0xab   : > { %p3501_p3 = pnand %p3499_p2, %p4546_p11  ;;  %p3508_p7 = por %p3507_p6, %p3506_p1 }
  0xad   : > { %p3502_p12 = pneg %p3501_p3 }
  0xaf   : > { %p3509_p10 = pnand %p3508_p7, %p3502_p12 }
  0xb1   : > { %3512 = shalt.err (!%p3509_p10)
}
  0xb2   : > { %s4548_s24 = smov 8   ;;  %s4549_s12 = smov 128  }
  0xb3   : > { %3227 = dma.hbm_to_vmem [thread:$0]  (!%p4547_p0), %s4477_s2, 256, %s472_s6, [#allocation7], %s4549_s12, %s4549_s12, %s4548_s24  }
  0xb4   : > { %s2802_s19 = sshll.u32 %s3649_s21, 9  ;;  %s517_s17 = scalar_lea.vmem [#allocation11], %s2741_s27 }
  0xb5   : > { %s3987_s13 = scalar_lea.hbm %s4480_s5, %s2802_s19  ;;  %s524_s1 = sshll.u32 %s517_s17, 4  ;;  %s3989_s1 = int_to_ptr.vmem [resolvable:$true] %s524_s1 }
  0xb6   : > { %s3513_s14 = scalar_lea.hbm %s3987_s13, 512  ;;  %p4550_p11 = scmp.ne.s32.totalorder %s4542_s15, 0 }
  0xb7   : > { %p3514_p10 = scmp.ne.s32.totalorder %s3987_s13, %s3513_s14  ;;  %s3518_s3 = scalar_lea.hbm %s4480_s5, 1024 }
  0xb8   : > { %p3519_p0 = scmp.lt.u32.totalorder %s3987_s13, %s4480_s5  ;;  %p3520_p5 = scmp.lt.u32.totalorder %s3518_s3, %s3513_s14 }
  0xb9   : > { %p3516_p8 = pnand %p3514_p10, %p4550_p11  ;;  %p3522_p13 = scmp.lt.u32.totalorder %s3513_s14, %s3987_s13 }
  0xba   : > { %p3521_p9 = por %p3520_p5, %p3519_p0 }
  0xbb   : > { %p3517_p4 = pneg %p3516_p8 }
  0xbc   : > { %p3523_p2 = por %p3522_p13, %p3521_p9 }
  0xbe   : > { %p3524_p3 = pnand %p3523_p2, %p3517_p4 }
  0xc0   : > { %3527 = shalt.err (!%p3524_p3)
}
  0xc1   : > { %s3528_s27 = scalar_lea.vmem %s3989_s1, 512  ;;  %s3662_s20 = smov [#allocation11]  }
  0xc2   : > { %p3529_p12 = scmp.ne.s32.totalorder %s3989_s1, %s3528_s27  ;;  %s3533_s9 = sshll.u32 %s3662_s20, 4  ;;  %s3534_s9 = int_to_ptr.vmem [resolvable:$false] %s3533_s9 }
  0xc3   : > { %s3535_s18 = scalar_lea.vmem %s3534_s9, 1024  ;;  %p3536_p7 = scmp.lt.s32.totalorder %s3989_s1, %s3534_s9 }
  0xc4   : > { %p3531_p1 = pnand %p3529_p12, %p4550_p11  ;;  %p3537_p10 = scmp.lt.s32.totalorder %s3535_s18, %s3528_s27 }
  0xc6   : > { %p3532_p6 = pneg %p3531_p1  ;;  %p3538_p8 = por %p3537_p10, %p3536_p7 }
  0xc8   : > { %p3539_p0 = pnand %p3538_p8, %p3532_p6 }
  0xca   : > { %3542 = shalt.err (!%p3539_p0)
}
  0xcb   : > { %p4551_p4 = scmp.ne.s32.totalorder %s4539_s25, 0  ;;  %s3543_s7 = scalar_lea.hbm %s3937_s4, 4096 }
  0xcc   : > { %p3544_p5 = scmp.ne.s32.totalorder %s3937_s4, %s3543_s7  ;;  %s3548_s28 = scalar_lea.hbm %s4486_s11, 8192 }
  0xcd   : > { %3234 = dma.hbm_to_vmem [thread:$0]  (!%p4551_p4), %s3987_s13, 512, %s3989_s1, %s3863_s23, %s4549_s12, %s4549_s12, %s4548_s24  }
  0xce   : > { %p3546_p9 = pnand %p3544_p5, %p4550_p11  ;;  %p3549_p2 = scmp.lt.u32.totalorder %s3937_s4, %s4486_s11 }
  0xcf   : > { %p3550_p3 = scmp.lt.u32.totalorder %s3548_s28, %s3543_s7  ;;  %p3552_p1 = scmp.lt.u32.totalorder %s3543_s7, %s3937_s4 }
  0xd0   : > { %p3547_p13 = pneg %p3546_p9 }
  0xd1   : > { %p3551_p12 = por %p3550_p3, %p3549_p2 }
  0xd3   : > { %p3553_p6 = por %p3552_p1, %p3551_p12 }
  0xd5   : > { %p3554_p7 = pnand %p3553_p6, %p3547_p13 }
  0xd7   : > { %3557 = shalt.err (!%p3554_p7)
}
  0xd8   : > { %s3558_s23 = scalar_lea.vmem %s3941_s16, 4096  ;;  %s3663_s13 = smov [#allocation14]  }
  0xd9   : > { %p3559_p10 = scmp.ne.s32.totalorder %s3941_s16, %s3558_s23  ;;  %s3563_s1 = sshll.u32 %s3663_s13, 4  ;;  %s3564_s1 = int_to_ptr.vmem [resolvable:$false] %s3563_s1 }
  0xda   : > { %s3565_s6 = scalar_lea.vmem %s3564_s1, 8192  ;;  %p3566_p5 = scmp.lt.s32.totalorder %s3941_s16, %s3564_s1 }
  0xdb   : > { %p3561_p8 = pnand %p3559_p10, %p4550_p11  ;;  %p3567_p9 = scmp.lt.s32.totalorder %s3565_s6, %s3558_s23 }
  0xdd   : > { %p3562_p0 = pneg %p3561_p8  ;;  %p3568_p2 = por %p3567_p9, %p3566_p5 }
  0xdf   : > { %p3569_p3 = pnand %p3568_p2, %p3562_p0 }
  0xe1   : > { %3572 = shalt.err (!%p3569_p3)
}
  0xe2   : > { %3240 = dma.hbm_to_vmem [thread:$0]  (!%p4551_p4), %s3937_s4, 4096, %s3941_s16, %s3908_s8, %s4549_s12, %s4549_s12, %s4548_s24  }
  0xe3   : > { %p4552_p11 = scmp.ne.s32.totalorder %s4533_s29, 0 }
  0xe4   : > { %p4553_p13 = scmp.eq.s32.totalorder (!%p4552_p11), %s3771_s22, 0 }
  0xe5   : > { %621 = sbr.rel (%p4552_p11) target bundleno = 3619 (0xe23), region = 80 }
  0xec   : > { %3616 = dma.done.wait (%p4553_p13), [#allocation4], 16   ;;  %p4554_p12 = pmov %p4553_p13 }
  0xee   : > { %3618 = vsyncadd (%p4554_p12), [#allocation4], 4294967280  ;;  %p4555_p1 = pmov %p4554_p12 }
  0xf0   : > { %3620 = dma.done.wait (%p4555_p1), [#allocation7], 512   ;;  %p4556_p6 = pmov %p4555_p1 }
  0xf1   : > { %s4557_s15 = sld [smem:[#allocation21_spill]]  ;;  %s4558_s25 = sld [smem:[#allocation25_spill]] }
  0xf2   : > { %3622 = vsyncadd (%p4556_p6), [#allocation7], 4294966784  ;;  %s635_s21 = sand.u32 1, %s3771_s22  }
  0xf3   : > { %s636_s29 = scalar_lea.sflag [#allocation10], %s635_s21 }
  0xf7   : > { %s637_s8 = sand.u32 1, %s4557_s15   ;;  %p4559_p4 = scmp.ne.s32.totalorder %s4558_s25, 0 }
  0xf8   : > { %s3192_s4 = smul.u32 384, %s637_s8 }
  0xfa   : > { %s4053_s16 = scalar_lea.vmem [#allocation9], %s3192_s4 }
  0xfb   : > { %3624 = dma.done.wait (%p4559_p4), %s636_s29, 6656  }
  0xfc   : > { %3626 = vsyncadd (%p4559_p4), %s636_s29, 4294960640  ;;  %s2754_s24 = sshll.u32 %s637_s8, 5  ;;  %s2755_s12 = sshll.u32 %s637_s8, 8 }
  0xfd   : > { %s4059_s3 = scalar_lea.vmem [#allocation11], %s2754_s24  ;;  %s654_s26 = scalar_lea.sflag [#allocation13], %s635_s21 }
  0xfe   : > { %s4061_s10 = scalar_lea.vmem [#allocation12], %s2755_s12 }
  0xff   : > { %3628 = dma.done.wait (%p4559_p4), %s654_s26, 8192  }
 0x100   : > { %3630 = vsyncadd (%p4559_p4), %s654_s26, 4294959104  ;;  %p749_p7 = scmp.lt.s32.totalorder %s3771_s22, 1  ;;  %s4560_s7 = sld [smem:[#allocation30_spill]] }
 0x101   : > { %s4563_s21 = sld [smem:[#allocation29_spill]]  ;;  %s4564_s26 = sld [smem:[#allocation34_spill]] }
 0x102   : > { %s4069_s27 = scalar_select %p749_p7, %s3771_s22, 1 }
 0x103   : > { %s4566_s14 = sld [smem:[#allocation36_spill]]  ;;  %s4567_s6 = sld [smem:[#allocation37_spill]] }
 0x104   : > { %s3193_s20 = smul.u32 3, %s4069_s27  ;;  %s2757_s4 = sshll.u32 %s4069_s27, 1 }
 0x105   : > { %p4568_p10 = scmp.ne.s32.totalorder %s3771_s22, 0 }
 0x106   : > { %s755_s19 = scalar_lea.vmem %s4560_s7, %s4069_s27  ;;  %s4565_s7 = sld [smem:[#allocation35_spill]]  ;;  %v779_v0 = vld [vmem:[#allocation8] sm:$0xff] (!%p4568_p10)  ;;  %v780_v1 = vld [vmem:[#allocation8 + $0x8] sm:$0xff] (!%p4568_p10) }
 0x107   : > { %s4087_s8 = scalar_lea.vmem %s4563_s21, %s3193_s20  ;;  %s4093_s0 = scalar_lea.vmem %s4564_s26, %s2757_s4  ;;  %781 = vst [vmem:[#allocation2] sm:$0xff] (!%p4568_p10), %v779_v0  ;;  %782 = vst [vmem:[#allocation2 + $0x8] sm:$0xff] (!%p4568_p10), %v780_v1 }
 0x108   : > { %s4107_s20 = scalar_lea.vmem [#allocation14], %s2755_s12  ;;  %778 = sbr.rel (%p4568_p10) target bundleno = 271 (0x10f), region = 112 }
 0x109   : > { %s771_s23 = scalar_lea.vmem %s4566_s14, %s4069_s27  ;;  %s774_s15 = scalar_lea.vmem %s4567_s6, %s4069_s27 }
 0x10c   : > { %s768_s30 = scalar_lea.vmem %s4565_s7, %s4069_s27 }
 0x10f PF: > { %v790_v2 = vld [vmem:[%s4053_s16 + $0x8] sm:$0xff]  ;;  %v793_v3 = vld [vmem:[%s4053_s16 + $0x20] sm:$0xff]  ;;  %v792_v6 = vld [vmem:[%s4053_s16 + $0x18] sm:$0xff]  ;;  %v3664_v9 = vmov 0.0   ;;  %v839_v53 = vlaneseq  ;;  %vm1010_vm0 = vcmask 64512   ;;  %s3665_s12 = smov 120  }
 0x110   : > { %v789_v4 = vld [vmem:[%s4053_s16] sm:$0xff]  ;;  %v3016_v5 = vpack.c.bf16 %v793_v3, %v790_v2  ;;  %v796_v7 = vld [vmem:[%s4053_s16 + $0x38] sm:$0xff]  ;;  %v799_v8 = vld [vmem:[%s4053_s16 + $0x50] sm:$0xff]  ;;  %918 = vmatprep.mubr.f32.mxu0 %v3664_v9  ;;  %vm1108_vm4 = vcmask 130048   ;;  %s3668_s14 = smov 104   ;;  %s4574_s21 = sld [smem:[#allocation31_spill]] }
 0x111   : > { %v3018_v10 = vpack.c.bf16 %v792_v6, %v789_v4  ;;  %v3020_v11 = vpack.c.bf16 %v799_v8, %v796_v7  ;;  %v795_v12 = vld [vmem:[%s4053_s16 + $0x30] sm:$0xff]  ;;  %v798_v13 = vld [vmem:[%s4053_s16 + $0x48] sm:$0xff]  ;;  %v805_v15 = vld [vmem:[%s4053_s16 + $0x80] sm:$0xff]  ;;  %v4152_v54 = vshrl.u32 %v839_v53, 7  ;;  %s4576_s24 = sld [smem:[#allocation32_spill]]  ;;  %p2797_p8 = scmp.ne.s32.totalorder %s3771_s22, 1 }
 0x112   : > { %v802_v14 = vld [vmem:[%s4053_s16 + $0x68] sm:$0xff]  ;;  %3017 = vmatprep.subr.bf16.mxu0 %v3016_v5  ;;  %v3022_v16 = vpack.c.bf16 %v798_v13, %v795_v12  ;;  %v801_v18 = vld [vmem:[%s4053_s16 + $0x60] sm:$0xff]  ;;  %v804_v19 = vld [vmem:[%s4053_s16 + $0x78] sm:$0xff] }
 0x113   : > { %3019 = vmatpush1.bf16.msra.mxu0 %v3018_v10  ;;  %v3024_v17 = vpack.c.bf16 %v805_v15, %v802_v14  ;;  %v808_v20 = vld [vmem:[%s4053_s16 + $0x98] sm:$0xff]  ;;  %v811_v21 = vld [vmem:[%s4053_s16 + $0xb0] sm:$0xff]  ;;  %v3026_v22 = vpack.c.bf16 %v804_v19, %v801_v18  ;;  %v810_v25 = vld [vmem:[%s4053_s16 + $0xa8] sm:$0xff]  ;;  %v4161_v63 = vsub.s32 0, %v4152_v54  ;;  %v845_v5 = vsub.s32 1, %v4152_v54 }
 0x114   : > { %3021 = vmatprep.subr.bf16.mxu0 %v3020_v11  ;;  %v3028_v23 = vpack.c.bf16 %v811_v21, %v808_v20  ;;  %v807_v24 = vld [vmem:[%s4053_s16 + $0x90] sm:$0xff]  ;;  %v814_v26 = vld [vmem:[%s4053_s16 + $0xc8] sm:$0xff]  ;;  %v817_v27 = vld [vmem:[%s4053_s16 + $0xe0] sm:$0xff] }
 0x115   : > { %v4130_v28 = vld [vmem:[#allocation2] sm:$0xff]  ;;  %v3030_v29 = vpack.c.bf16 %v810_v25, %v807_v24  ;;  %v3032_v30 = vpack.c.bf16 %v817_v27, %v814_v26  ;;  %v813_v31 = vld [vmem:[%s4053_s16 + $0xc0] sm:$0xff]  ;;  %v816_v32 = vld [vmem:[%s4053_s16 + $0xd8] sm:$0xff] }
 0x116   : > { %2937 = vmatprep.mubr.f32.mxu1 %v4130_v28  ;;  %v820_v33 = vld [vmem:[%s4053_s16 + $0xf8] sm:$0xff]  ;;  %v823_v34 = vld [vmem:[%s4053_s16 + $0x110] sm:$0xff]  ;;  %v3034_v35 = vpack.c.bf16 %v816_v32, %v813_v31  ;;  %v822_v38 = vld [vmem:[%s4053_s16 + $0x108] sm:$0xff] }
 0x117   : > { %3023 = vmatpush1.bf16.msra.mxu0 %v3022_v16  ;;  %v3036_v36 = vpack.c.bf16 %v823_v34, %v820_v33  ;;  %v819_v37 = vld [vmem:[%s4053_s16 + $0xf0] sm:$0xff]  ;;  %v826_v39 = vld [vmem:[%s4053_s16 + $0x128] sm:$0xff]  ;;  %v829_v40 = vld [vmem:[%s4053_s16 + $0x140] sm:$0xff]  ;;  %v3666_v34 = vmov 0   ;;  %s4577_s26 = scalar_lea.vmem %s4576_s24, %s4069_s27 }
 0x118   : > { %3025 = vmatprep.subr.bf16.mxu0 %v3024_v17  ;;  %v3038_v41 = vpack.c.bf16 %v822_v38, %v819_v37  ;;  %v3040_v42 = vpack.c.bf16 %v829_v40, %v826_v39  ;;  %v825_v43 = vld [vmem:[%s4053_s16 + $0x120] sm:$0xff]  ;;  %v828_v44 = vld [vmem:[%s4053_s16 + $0x138] sm:$0xff]  ;;  %v835_v46 = vld [vmem:[%s4053_s16 + $0x170] sm:$0xff] }
 0x119   : > { %v832_v45 = vld [vmem:[%s4053_s16 + $0x158] sm:$0xff]  ;;  %v3042_v47 = vpack.c.bf16 %v828_v44, %v825_v43  ;;  %v831_v49 = vld [vmem:[%s4053_s16 + $0x150] sm:$0xff]  ;;  %v834_v50 = vld [vmem:[%s4053_s16 + $0x168] sm:$0xff] }
 0x11a   : > { %v3044_v48 = vpack.c.bf16 %v835_v46, %v832_v45  ;;  %v3046_v51 = vpack.c.bf16 %v834_v50, %v831_v49  ;;  %v4149_v52 = vld [vmem:[#allocation2 + $0x8] sm:$0xff]  ;;  %v794_v56 = vld [vmem:[%s4053_s16 + $0x28] sm:$0xff]  ;;  %v797_v57 = vld [vmem:[%s4053_s16 + $0x40] sm:$0xff] }
 0x11b   : > { %3027 = vmatpush1.bf16.msra.mxu0 %v3026_v22  ;;  %v791_v55 = vld [vmem:[%s4053_s16 + $0x10] sm:$0xff]  ;;  %v800_v59 = vld [vmem:[%s4053_s16 + $0x58] sm:$0xff]  ;;  %v806_v62 = vld [vmem:[%s4053_s16 + $0x88] sm:$0xff] }
 0x11c   : > { %3029 = vmatprep.subr.bf16.mxu0 %v3028_v23  ;;  %v3048_v58 = vpack.c.bf16 %v794_v56, %v791_v55  ;;  %v3052_v60 = vpack.c.bf16 %v800_v59, %v797_v57  ;;  %v803_v61 = vld [vmem:[%s4053_s16 + $0x70] sm:$0xff]  ;;  %v809_v2 = vld [vmem:[%s4053_s16 + $0xa0] sm:$0xff]  ;;  %v812_v3 = vld [vmem:[%s4053_s16 + $0xb8] sm:$0xff] }
 0x11d   : > { %v4164_v0 = vld [vmem:[%s4087_s8] sm:$0x7]  ;;  %v3056_v1 = vpack.c.bf16 %v806_v62, %v803_v61  ;;  %v3060_v6 = vpack.c.bf16 %v812_v3, %v809_v2  ;;  %v821_v15 = vld [vmem:[%s4053_s16 + $0x100] sm:$0xff]  ;;  %v824_v16 = vld [vmem:[%s4053_s16 + $0x118] sm:$0xff]  ;;  %s4575_s8 = scalar_lea.vmem %s4574_s21, %s4069_s27 }
 0x11e   : > { %3049 = vmatprep.subr.bf16.mxu1 %v3048_v58  ;;  %v842_v4 = vrot.slane %v4164_v0, %v4161_v63  ;;  %v815_v7 = vld [vmem:[%s4053_s16 + $0xd0] sm:$0xff]  ;;  %v818_v8 = vld [vmem:[%s4053_s16 + $0xe8] sm:$0xff]  ;;  %v846_v13 = vrot.slane %v4164_v0, %v845_v5  ;;  %v3068_v21 = vpack.c.bf16 %v824_v16, %v821_v15  ;;  %vm4186_vm1 = vmpackc.low %vm1010_vm0, %vm1010_vm0 }
 0x11f   : > { %3031 = vmatpush1.bf16.msra.mxu0 %v3030_v29  ;;  %3051 = vmatpush3.bf16.msra.mxu1 %v3048_v58  ;;  %v3064_v14 = vpack.c.bf16 %v818_v8, %v815_v7  ;;  %v827_v23 = vld [vmem:[%s4053_s16 + $0x130] sm:$0xff]  ;;  %v830_v24 = vld [vmem:[%s4053_s16 + $0x148] sm:$0xff]  ;;  %v833_v29 = vld [vmem:[%s4053_s16 + $0x160] sm:$0xff] }
 0x120   : > { %3033 = vmatprep.subr.bf16.mxu0 %v3032_v30  ;;  %3053 = vmatprep.subr.bf16.mxu1 %v3052_v60  ;;  %v3072_v27 = vpack.c.bf16 %v830_v24, %v827_v23  ;;  %v836_v30 = vld [vmem:[%s4053_s16 + $0x178] sm:$0xff]  ;;  %v4210_v39 = vld [vmem:[#allocation6] sm:$0xff]  ;;  %s3667_s16 = smov 112  }
 0x121   : > { %v3076_v31 = vpack.c.bf16 %v836_v30, %v833_v29  ;;  %v785_v33 = vld [vmem:[#allocation3] sm:$0x1] }
 0x122   : > { %vm786_vm2 = vcmp.gt.f32.partialorder %v785_v33, 0.5 }
 0x123   : > { %3035 = vmatpush1.bf16.msra.mxu0 %v3034_v35  ;;  %3055 = vmatpush3.bf16.msra.mxu1 %v3052_v60  ;;  %v1098_v35 = vsel %vm786_vm2, 1, %v3666_v34 }
 0x124   : > { %3037 = vmatprep.subr.bf16.mxu0 %v3036_v36  ;;  %3057 = vmatprep.subr.bf16.mxu1 %v3056_v1  ;;  %v1102_v36 = vrot.slane %v1098_v35, %v4161_v63 }
 0x126   : > { %vm4206_vm3 = vcmp.eq.s32.totalorder %v1102_v36, 1 }
 0x127   : > { %3039 = vmatpush1.bf16.msra.mxu0 %v3038_v41  ;;  %3059 = vmatpush3.bf16.msra.mxu1 %v3056_v1  ;;  %v4212_v41 = vld [vmem:[#allocation6 + $0x8] sm:$0xff] }
 0x128   : > { %3041 = vmatprep.subr.bf16.mxu0 %v3040_v42  ;;  %3061 = vmatprep.subr.bf16.mxu1 %v3060_v6 }
 0x12b   : > { %3043 = vmatpush1.bf16.msra.mxu0 %v3042_v47  ;;  %3063 = vmatpush3.bf16.msra.mxu1 %v3060_v6 }
 0x12c   : > { %3045 = vmatprep.subr.bf16.mxu0 %v3044_v48  ;;  %3065 = vmatprep.subr.bf16.mxu1 %v3064_v14  ;;  %v849_v48 = vsub.s32 2, %v4152_v54  ;;  %v2794_v54 = vld [vmem:[%s768_s30] ss:$0 sm:$0xff] }
 0x12e   : > { %v850_v49 = vrot.slane %v4164_v0, %v849_v48 }
 0x12f   : > { %3047 = vmatpush1.bf16.msra.mxu0 %v3046_v51  ;;  %3067 = vmatpush3.bf16.msra.mxu1 %v3064_v14 }
 0x130   : > { %3069 = vmatprep.subr.bf16.mxu1 %v3068_v21 }
 0x132   : > { %919 = vmatmul.mubr.f32.vlgmr.msra.gmra.mrb[0].mxu0 %v4130_v28 }
 0x133   : > { %924 = vmatprep.mubr.f32.mxu0 %v3664_v9  ;;  %3071 = vmatpush3.bf16.msra.mxu1 %v3068_v21 }
 0x134   : > { %3073 = vmatprep.subr.bf16.mxu1 %v3072_v27 }
 0x136   : > { %925 = vmatmul.mubr.f32.gmra.mrb[2].mxu0 %v4149_v52 }
 0x137   : > { %3075 = vmatpush3.bf16.msra.mxu1 %v3072_v27 }
 0x138   : > { %3077 = vmatprep.subr.bf16.mxu1 %v3076_v31 }
 0x13b   : > { %3079 = vmatpush3.bf16.msra.mxu1 %v3076_v31 }
 0x13e   : > { %2938 = vmatmul.mubr.f32.vlgmr.msra.gmra.mrb[0].mxu1 %v4149_v52 }
 0x205   : > { %v920_v10 = vpop.f32.mrb[0].mxu0 }
 0x206   : > { %v4173_v11 = vadd.f32 %v920_v10, %v842_v4  ;;  %v922_v12 = vpop.f32.mrb[1].mxu0 }
 0x207   : > { %v923_v19 = vadd.f32 %v922_v12, %v846_v13 }
 0x208   : > { %1212 = vrot.lane.b32.xlu1 %v4173_v11, %s3665_s12  ;;  %2944 = vmatprep.mubr.msk.f32.mxu0 %vm1010_vm0, %v4173_v11 }
 0x209   : > { %v926_v17 = vpop.f32.mrb[2].mxu0 }
 0x20a   : > { %v928_v18 = vpop.f32.mrb[3].mxu0  ;;  %v4200_v32 = vadd.f32 %v926_v17, %v842_v4 }
 0x20b   : > { %v929_v20 = vadd.f32 %v928_v18, %v846_v13 }
 0x20d   : > { %v3080_v25 = vpack.c.bf16 %v929_v20, %v923_v19  ;;  %v4192_v26 = vpack.i.bf16 %v929_v20, %v923_v19 }
 0x20f   : > { %3082 = vmatprep.subr.msk.bf16.mxu0 %vm4186_vm1, %v3080_v25 }
 0x210   : > { %3085 = vmatpush3.bf16.xpose.msk.msra.mxu0 %vm4186_vm1, %v3080_v25 }
 0x211   : > { %v2939_v50 = vpop.f32.mrb[0].mxu1 }
 0x212   : > { %v997_v51 = vpop.f32.mrb[1].mxu1  ;;  %v1003_v53 = vadd.f32 %v2939_v50, %v850_v49 }
 0x213   : > { %v998_v55 = vadd.f32 %v997_v51, %v850_v49 }
 0x215   : > { %v3086_v56 = vpack.c.bf16 %v1003_v53, %v998_v55  ;;  %v4250_v33 = vpack.i.bf16 %v1003_v53, %v998_v55 }
 0x217   : > { %2945 = vmatmul.mubr.msk.f32.vlgmr.msra.gmra.mrb[4].mxu0 %vm1010_vm0, %v4200_v32  ;;  %3087 = vmatprep.subr.bf16.mxu1 %v3086_v56 }
 0x218   : > { %3089 = vmatpush3.bf16.msra.mxu1 %v3086_v56 }
 0x27a   : > { %v1213_v10 = vpop.permute.xlu1 %1212 }
 0x2ea   : > { %v2946_v38 = vpop.f32.mrb[4].mxu0 }
 0x2eb   : > { %v1089_v40 = vpop.f32.mrb[5].mxu0  ;;  %v1105_v42 = vsel %vm4206_vm3, -1e-09, %v2946_v38 }
 0x2ec   : > { %v1104_v43 = vsel %vm4206_vm3, -1e-09, %v1089_v40  ;;  %v1107_v45 = vadd.f32 %v1105_v42, %v4212_v41 }
 0x2ed   : > { %v1106_v44 = vadd.f32 %v1104_v43, %v4210_v39 }
 0x2ee   : > { %v1112_v47 = vsel %vm1108_vm4, %v1107_v45, -inf }
 0x2ef   : > { %v1109_v46 = vsel %vm1108_vm4, %v1106_v44, -inf }
 0x2f0   : > { %1110 = vmax.xlane.f32.xlu0 %v1109_v46 }
 0x2f4   : > { %1113 = vmax.xlane.f32.xlu0 %v1112_v47 }
 0x30a   : > { %3300 = vrot.lane.b32.xlu0 %v4192_v26, %s3665_s12 }
 0x37d   : > { %v1111_v57 = vpop.xlane.xlu0 %1110 }
 0x37e   : > { %v1115_v58 = vsub.f32 %v1106_v44, %v1111_v57 }
 0x380   : > { %v1117_v61 = vmul.f32 1.442695, %v1115_v58 }
 0x381   : > { %v1114_v59 = vpop.xlane.xlu0 %1113 }
 0x382   : > { %v1116_v60 = vsub.f32 %v1107_v45, %v1114_v59 }
 0x384   : > { %v1119_v62 = vmul.f32 1.442695, %v1116_v60 }
 0x385   : > { %v3301_v1 = vpop.permute.xlu0 %3300 }
 0x386   : > { %3329 = vpow2.f32 %v1119_v62  ;;  %v3303_v2 = vunpack.i.h.bf16 %v3301_v1  ;;  %v3302_v0 = vunpack.i.l.bf16 %v3301_v1 }
 0x387   : > { %3331 = vpow2.f32 %v1117_v61 }
 0x388   : > { %v3090_v3 = vpack.c.bf16 %v3303_v2, %v3302_v0 }
 0x38a   : > { %3092 = vmatprep.subr.msk.bf16.mxu1 %vm4186_vm1, %v3090_v3 }
 0x390   : > { %v3330_v4 = vpop.eup %3329 }
 0x391   : > { %v1124_v6 = vsel %vm1108_vm4, %v3330_v4, 0.0  ;;  %v3332_v7 = vpop.eup %3331 }
 0x392   : > { %1125 = vadd.xlane.f32.xlu1 %v1124_v6  ;;  %v1121_v8 = vsel %vm1108_vm4, %v3332_v7, 0.0  ;;  %v1007_v6 = vld [vmem:[%s4059_s3 + $0x8] sm:$0xff] }
 0x393   : > { %2968 = vmatprep.subr.mxu0 %v1007_v6 }
 0x394   : > { %2969 = vmatpush3.msra.mxu0 %v1007_v6 }
 0x396   : > { %1122 = vadd.xlane.f32.xlu1 %v1121_v8 }
 0x3a7   : > { %1214 = vrot.lane.b32.xlu1 %v4200_v32, %s3665_s12 }
 0x41f   : > { %v1126_v12 = vpop.xlane.xlu1 %1125 }
 0x420   : > { %3333 = vrcp.f32 %v1126_v12 }
 0x423   : > { %v1123_v13 = vpop.xlane.xlu1 %1122 }
 0x424   : > { %3335 = vrcp.f32 %v1123_v13 }
 0x427   : > { %v1215_v18 = vpop.permute.xlu1 %1214 }
 0x42a   : > { %v3334_v14 = vpop.eup %3333 }
 0x42b   : > { %v1130_v17 = vmul.f32 %v3334_v14, %v3330_v4 }
 0x42e   : > { %v3336_v15 = vpop.eup %3335 }
 0x42f   : > { %v1129_v16 = vmul.f32 %v3336_v15, %v3332_v7  ;;  %v1006_v7 = vld [vmem:[%s4059_s3] sm:$0xff] }
 0x430   : > { %2973 = vmatprep.subr.mxu0 %v1006_v7 }
 0x431   : > { %2951 = vmatprep.mubr.msk.f32.mxu1 %vm1108_vm4, %v1129_v16 }
 0x432   : > { %2952 = vmatmul.mubr.msk.f32.vlgmr.msra.gmra.mrb[2].mxu1 %vm1108_vm4, %v1130_v17 }
 0x433   : > { %3095 = vmatpush3.bf16.xpose.msk.msra.mxu1 %vm4186_vm1, %v3090_v3  ;;  %2958 = vmatprep.mubr.msk.f32.mxu1 %vm1010_vm0, %v1213_v10 }
 0x43a   : > { %2959 = vmatmul.mubr.msk.f32.vlgmr.msra.gmra.mrb[4].mxu1 %vm1010_vm0, %v1215_v18 }
 0x505   : > { %v4238_v19 = vpop.f32.mrb[2].mxu1 }
 0x506   : > { %v4240_v20 = vpop.f32.mrb[3].mxu1 }
 0x50d   : > { %v2960_v21 = vpop.f32.mrb[4].mxu1 }
 0x50e   : > { %v1304_v23 = vsel %vm4206_vm3, -1e-09, %v2960_v21  ;;  %v1294_v24 = vpop.f32.mrb[5].mxu1 }
 0x50f   : > { %v1306_v25 = vadd.f32 %v1304_v23, %v4212_v41  ;;  %v1303_v27 = vsel %vm4206_vm3, -1e-09, %v1294_v24 }
 0x510   : > { %v1305_v29 = vadd.f32 %v1303_v27, %v4210_v39 }
 0x511   : > { %v1310_v30 = vsel %vm1108_vm4, %v1306_v25, -inf }
 0x512   : > { %1311 = vmax.xlane.f32.xlu0 %v1310_v30  ;;  %v1307_v31 = vsel %vm1108_vm4, %v1305_v29, -inf }
 0x513   : > { %1308 = vmax.xlane.f32.xlu1 %v1307_v31 }
 0x524   : > { %3305 = vrot.lane.b32.xlu1 %v4250_v33, %s3665_s12 }
 0x528   : > { %1580 = vrot.lane.b32.xlu1 %v4173_v11, %s3667_s16 }
 0x52c   : > { %1582 = vrot.lane.b32.xlu1 %v4200_v32, %s3667_s16 }
 0x530   : > { %3315 = vrot.lane.b32.xlu1 %v4192_v26, %s3668_s14 }
 0x534   : > { %1869 = vrot.lane.b32.xlu1 %v4200_v32, %s3668_s14 }
 0x59f   : > { %v1312_v34 = vpop.xlane.xlu0 %1311 }
 0x5a0   : > { %v1314_v35 = vsub.f32 %v1306_v25, %v1312_v34  ;;  %v1309_v36 = vpop.xlane.xlu1 %1308 }
 0x5a1   : > { %v1313_v38 = vsub.f32 %v1305_v29, %v1309_v36 }
 0x5a2   : > { %v1317_v40 = vmul.f32 1.442695, %v1314_v35 }
 0x5a3   : > { %v1315_v42 = vmul.f32 1.442695, %v1313_v38 }
 0x5a4   : > { %3337 = vpow2.f32 %v1317_v40  ;;  %v3306_v43 = vpop.permute.xlu1 %3305 }
 0x5a5   : > { %v3308_v44 = vunpack.i.h.bf16 %v3306_v43  ;;  %v3307_v45 = vunpack.i.l.bf16 %v3306_v43  ;;  %3339 = vpow2.f32 %v1315_v42 }
 0x5a7   : > { %v3096_v46 = vpack.c.bf16 %v3308_v44, %v3307_v45 }
 0x5a8   : > { %v1581_v50 = vpop.permute.xlu1 %1580 }
 0x5a9   : > { %3097 = vmatprep.subr.bf16.mxu1 %v3096_v46 }
 0x5aa   : > { %3099 = vmatpush3.bf16.msra.mxu1 %v3096_v46 }
 0x5ac   : > { %v1583_v55 = vpop.permute.xlu1 %1582 }
 0x5ae   : > { %v3338_v47 = vpop.eup %3337 }
 0x5af   : > { %v1322_v48 = vsel %vm1108_vm4, %v3338_v47, 0.0  ;;  %v3340_v49 = vpop.eup %3339 }
 0x5b0   : > { %1323 = vadd.xlane.f32.xlu0 %v1322_v48  ;;  %v1319_v32 = vsel %vm1108_vm4, %v3340_v49, 0.0  ;;  %v3316_v60 = vpop.permute.xlu1 %3315 }
 0x5b1   : > { %v3317_v1 = vunpack.i.l.bf16 %v3316_v60 }
 0x5b4   : > { %1320 = vadd.xlane.f32.xlu0 %v1319_v32  ;;  %v1870_v4 = vpop.permute.xlu1 %1869 }
 0x5ca   : > { %3310 = vrot.lane.b32.xlu0 %v4192_v26, %s3667_s16  ;;  %v3318_v26 = vunpack.i.h.bf16 %v3316_v60 }
 0x5cc   : > { %v3110_v0 = vpack.c.bf16 %v3318_v26, %v3317_v1 }
 0x5ce   : > { %1867 = vrot.lane.b32.xlu0 %v4173_v11, %s3668_s14 }
 0x63d   : > { %v1324_v51 = vpop.xlane.xlu0 %1323 }
 0x63e   : > { %3341 = vrcp.f32 %v1324_v51 }
 0x641   : > { %v1321_v53 = vpop.xlane.xlu0 %1320 }
 0x642   : > { %3343 = vrcp.f32 %v1321_v53 }
 0x645   : > { %v3311_v56 = vpop.permute.xlu0 %3310 }
 0x646   : > { %v3313_v57 = vunpack.i.h.bf16 %v3311_v56  ;;  %v3312_v58 = vunpack.i.l.bf16 %v3311_v56 }
 0x648   : > { %v3100_v59 = vpack.c.bf16 %v3313_v57, %v3312_v58  ;;  %v3342_v61 = vpop.eup %3341 }
 0x649   : > { %v1328_v2 = vmul.f32 %v3342_v61, %v3338_v47  ;;  %v1868_v3 = vpop.permute.xlu0 %1867 }
 0x64a   : > { %3102 = vmatprep.subr.msk.bf16.mxu1 %vm4186_vm1, %v3100_v59 }
 0x64c   : > { %v3344_v62 = vpop.eup %3343 }
 0x64d   : > { %v1327_v11 = vmul.f32 %v3344_v62, %v3340_v49 }
 0x64f   : > { %2965 = vmatprep.mubr.msk.f32.mxu1 %vm1108_vm4, %v1327_v11 }
 0x650   : > { %2966 = vmatmul.mubr.msk.f32.vlgmr.msra.gmra.mrb[6].mxu1 %vm1108_vm4, %v1328_v2 }
 0x651   : > { %3105 = vmatpush3.bf16.xpose.msk.msra.mxu1 %vm4186_vm1, %v3100_v59  ;;  %2982 = vmatprep.mubr.msk.f32.mxu1 %vm1010_vm0, %v1581_v50  ;;  %v1008_v59 = vld [vmem:[%s4059_s3 + $0x10] sm:$0xff] }
 0x652   : > { %3112 = vmatprep.subr.msk.bf16.mxu1 %vm4186_vm1, %v3110_v0 }
 0x658   : > { %2983 = vmatmul.mubr.msk.f32.vlgmr.msra.gmra.mrb[8].mxu1 %vm1010_vm0, %v1583_v55 }
 0x659   : > { %3115 = vmatpush3.bf16.xpose.msk.msra.mxu1 %vm4186_vm1, %v3110_v0  ;;  %3001 = vmatprep.mubr.msk.f32.mxu1 %vm1010_vm0, %v1868_v3 }
 0x660   : > { %3002 = vmatmul.mubr.msk.f32.vlgmr.msra.gmra.mrb[10].mxu1 %vm1010_vm0, %v1870_v4 }
 0x661   : > { %2318 = vmatprep.mubr.f32.mxu1 %v3664_v9 }
 0x723   : > { %v2967_v8 = vpop.f32.mrb[6].mxu1 }
 0x724   : > { %v1409_v10 = vpop.f32.mrb[7].mxu1 }
 0x725   : > { %2970 = vmatprep.mubr.msk.f32.mxu0 %vm1010_vm0, %v1409_v10 }
 0x726   : > { %2971 = vmatmul.mubr.msk.f32.vlgmr.msra.gmra.mrb[6].mxu0 %vm1010_vm0, %v2967_v8 }
 0x727   : > { %2975 = vmatprep.mubr.msk.f32.mxu0 %vm1010_vm0, %v4240_v20  ;;  %2974 = vmatpush3.msra.mxu0 %v1006_v7 }
 0x72b   : > { %v2984_v22 = vpop.f32.mrb[8].mxu1 }
 0x72c   : > { %v1672_v12 = vsel %vm4206_vm3, -1e-09, %v2984_v22  ;;  %v1662_v13 = vpop.f32.mrb[9].mxu1  ;;  %v1009_v22 = vld [vmem:[%s4059_s3 + $0x18] sm:$0xff] }
 0x72d   : > { %v1674_v14 = vadd.f32 %v1672_v12, %v4212_v41  ;;  %v1671_v15 = vsel %vm4206_vm3, -1e-09, %v1662_v13 }
 0x72e   : > { %v1673_v16 = vadd.f32 %v1671_v15, %v4210_v39  ;;  %2976 = vmatmul.mubr.msk.f32.vlgmr.msra.gmra.mrb[6].mxu0 %vm1010_vm0, %v4238_v19  ;;  %v2211_v15 = vld [vmem:[%s4061_s10 + $0x8] sm:$0xff] }
 0x72f   : > { %v1678_v17 = vsel %vm1108_vm4, %v1674_v14, -inf }
 0x730   : > { %1679 = vmax.xlane.f32.xlu1 %v1678_v17  ;;  %v1675_v18 = vsel %vm1108_vm4, %v1673_v16, -inf  ;;  %v2210_v17 = vld [vmem:[%s4061_s10] sm:$0xff] }
 0x731   : > { %1676 = vmax.xlane.f32.xlu0 %v1675_v18 }
 0x733   : > { %v3003_v20 = vpop.f32.mrb[10].mxu1 }
 0x734   : > { %v1949_v21 = vpop.f32.mrb[11].mxu1  ;;  %v1959_v23 = vsel %vm4206_vm3, -1e-09, %v3003_v20  ;;  %v2212_v20 = vld [vmem:[%s4061_s10 + $0x10] sm:$0xff] }
 0x735   : > { %v1958_v24 = vsel %vm4206_vm3, -1e-09, %v1949_v21  ;;  %v1961_v27 = vadd.f32 %v1959_v23, %v4212_v41  ;;  %v2215_v21 = vld [vmem:[%s4061_s10 + $0x28] sm:$0xff]  ;;  %v2217_v23 = vld [vmem:[%s4061_s10 + $0x38] sm:$0xff] }
 0x736   : > { %v1960_v25 = vadd.f32 %v1958_v24, %v4210_v39  ;;  %v3122_v24 = vpack.c.bf16 %v2212_v20, %v2210_v17  ;;  %v2353_v17 = vld [vmem:[%s4107_s20 + $0x90] sm:$0xff] }
 0x737   : > { %v1965_v29 = vsel %vm1108_vm4, %v1961_v27, -inf }
 0x738   : > { %v1962_v19 = vsel %vm1108_vm4, %v1960_v25, -inf }
 0x739   : > { %1963 = vmax.xlane.f32.xlu1 %v1962_v19  ;;  %v2216_v19 = vld [vmem:[%s4061_s10 + $0x30] sm:$0xff] }
 0x73d   : > { %1966 = vmax.xlane.f32.xlu1 %v1965_v29 }
 0x7bd   : > { %v1680_v30 = vpop.xlane.xlu1 %1679 }
 0x7be   : > { %v1682_v31 = vsub.f32 %v1674_v14, %v1680_v30  ;;  %v1677_v34 = vpop.xlane.xlu0 %1676  ;;  %v2791_v30 = vld [vmem:[%s755_s19] ss:$0 sm:$0xff] }
 0x7bf   : > { %v1681_v35 = vsub.f32 %v1673_v16, %v1677_v34  ;;  %v2213_v16 = vld [vmem:[%s4061_s10 + $0x18] sm:$0xff] }
 0x7c0   : > { %v1685_v36 = vmul.f32 1.442695, %v1682_v31  ;;  %v3120_v18 = vpack.c.bf16 %v2213_v16, %v2211_v15  ;;  %v2336_v16 = vld [vmem:[%s4107_s20 + $0x8] sm:$0xff] }
 0x7c1   : > { %v1683_v38 = vmul.f32 1.442695, %v1681_v35 }
 0x7c2   : > { %3345 = vpow2.f32 %v1685_v36  ;;  %3121 = vmatprep.subr.bf16.mxu1 %v3120_v18  ;;  %v2354_v18 = vld [vmem:[%s4107_s20 + $0x98] sm:$0xff] }
 0x7c3   : > { %3347 = vpow2.f32 %v1683_v38  ;;  %3123 = vmatpush1.bf16.msra.mxu1 %v3122_v24  ;;  %v2338_v24 = vld [vmem:[%s4107_s20 + $0x18] sm:$0xff] }
 0x7c6   : > { %v1964_v37 = vpop.xlane.xlu1 %1963 }
 0x7c7   : > { %v1968_v40 = vsub.f32 %v1960_v25, %v1964_v37  ;;  %v3124_v25 = vpack.c.bf16 %v2217_v23, %v2215_v21  ;;  %v3156_v21 = vpack.c.bf16 %v2354_v18, %v2353_v17  ;;  %v2337_v23 = vld [vmem:[%s4107_s20 + $0x10] sm:$0xff]  ;;  %v2347_v18 = vld [vmem:[%s4107_s20 + $0x60] sm:$0xff] }
 0x7c9   : > { %v1970_v41 = vmul.f32 1.442695, %v1968_v40  ;;  %3125 = vmatprep.subr.bf16.mxu1 %v3124_v25  ;;  %v2355_v25 = vld [vmem:[%s4107_s20 + $0xa0] sm:$0xff] }
 0x7ca   : > { %v1967_v42 = vpop.xlane.xlu1 %1966 }
 0x7cb   : > { %v1969_v39 = vsub.f32 %v1961_v27, %v1967_v42  ;;  %v2214_v27 = vld [vmem:[%s4061_s10 + $0x20] sm:$0xff] }
 0x7cc   : > { %v3346_v43 = vpop.eup %3345  ;;  %v3126_v29 = vpack.c.bf16 %v2216_v19, %v2214_v27  ;;  %v2356_v27 = vld [vmem:[%s4107_s20 + $0xa8] sm:$0xff]  ;;  %v3158_v19 = vpack.c.bf16 %v2338_v24, %v2337_v23  ;;  %v2365_v23 = vld [vmem:[%s4107_s20 + $0xf0] sm:$0xff]  ;;  %v2366_v24 = vld [vmem:[%s4107_s20 + $0xf8] sm:$0xff] }
 0x7cd   : > { %v1972_v44 = vmul.f32 1.442695, %v1969_v39  ;;  %v1690_v45 = vsel %vm1108_vm4, %v3346_v43, 0.0  ;;  %v3348_v46 = vpop.eup %3347  ;;  %v2221_v39 = vld [vmem:[%s4061_s10 + $0x58] sm:$0xff] }
 0x7ce   : > { %1691 = vadd.xlane.f32.xlu0 %v1690_v45  ;;  %v1687_v47 = vsel %vm1108_vm4, %v3348_v46, 0.0  ;;  %3127 = vmatpush1.bf16.msra.mxu1 %v3126_v29  ;;  %v2223_v45 = vld [vmem:[%s4061_s10 + $0x68] sm:$0xff]  ;;  %v3160_v29 = vpack.c.bf16 %v2356_v27, %v2355_v25  ;;  %v3180_v25 = vpack.c.bf16 %v2366_v24, %v2365_v23  ;;  %v2350_v27 = vld [vmem:[%s4107_s20 + $0x78] sm:$0xff] }
 0x7cf   : > { %3349 = vpow2.f32 %v1972_v44  ;;  %v2220_v44 = vld [vmem:[%s4061_s10 + $0x50] sm:$0xff] }
 0x7d0   : > { %3351 = vpow2.f32 %v1970_v41  ;;  %v2218_v41 = vld [vmem:[%s4061_s10 + $0x40] sm:$0xff] }
 0x7d2   : > { %1688 = vadd.xlane.f32.xlu0 %v1687_v47 }
 0x7d9   : > { %v3350_v48 = vpop.eup %3349 }
 0x7da   : > { %v1977_v49 = vsel %vm1108_vm4, %v3350_v48, 0.0  ;;  %v3352_v32 = vpop.eup %3351 }
 0x7db   : > { %1978 = vadd.xlane.f32.xlu1 %v1977_v49  ;;  %v1974_v50 = vsel %vm1108_vm4, %v3352_v32, 0.0  ;;  %v2224_v49 = vld [vmem:[%s4061_s10 + $0x70] sm:$0xff] }
 0x7df   : > { %1975 = vadd.xlane.f32.xlu1 %v1974_v50  ;;  %v2227_v50 = vld [vmem:[%s4061_s10 + $0x88] sm:$0xff] }
 0x7e8   : > { %3320 = vrot.lane.b32.xlu0 %v4250_v33, %s3667_s16 }
 0x7f0   : > { %3325 = vrot.lane.b32.xlu1 %v4250_v33, %s3668_s14 }
 0x85b   : > { %v1692_v51 = vpop.xlane.xlu0 %1691 }
 0x85c   : > { %3353 = vrcp.f32 %v1692_v51  ;;  %v2229_v51 = vld [vmem:[%s4061_s10 + $0x98] sm:$0xff] }
 0x85f   : > { %v1689_v53 = vpop.xlane.xlu0 %1688 }
 0x860   : > { %3355 = vrcp.f32 %v1689_v53  ;;  %v3136_v53 = vpack.c.bf16 %v2229_v51, %v2227_v50  ;;  %v2346_v50 = vld [vmem:[%s4107_s20 + $0x58] sm:$0xff]  ;;  %v2363_v51 = vld [vmem:[%s4107_s20 + $0xe0] sm:$0xff] }
 0x863   : > { %v3321_v55 = vpop.permute.xlu0 %3320 }
 0x864   : > { %v3323_v56 = vunpack.i.h.bf16 %v3321_v55  ;;  %v3322_v57 = vunpack.i.l.bf16 %v3321_v55  ;;  %v2226_v55 = vld [vmem:[%s4061_s10 + $0x80] sm:$0xff] }
 0x866   : > { %v3106_v58 = vpack.c.bf16 %v3323_v56, %v3322_v57  ;;  %v3354_v61 = vpop.eup %3353  ;;  %v2228_v56 = vld [vmem:[%s4061_s10 + $0x90] sm:$0xff] }
 0x867   : > { %v1696_v1 = vmul.f32 %v3354_v61, %v3346_v43  ;;  %v3138_v57 = vpack.c.bf16 %v2228_v56, %v2226_v55  ;;  %v2230_v61 = vld [vmem:[%s4061_s10 + $0xa0] sm:$0xff] }
 0x868   : > { %v1979_v60 = vpop.xlane.xlu1 %1978  ;;  %3107 = vmatprep.subr.bf16.mxu0 %v3106_v58 }
 0x869   : > { %3109 = vmatpush3.bf16.msra.mxu0 %v3106_v58  ;;  %v2231_v58 = vld [vmem:[%s4061_s10 + $0xa8] sm:$0xff] }
 0x86a   : > { %v3356_v62 = vpop.eup %3355  ;;  %2992 = vmatprep.subr.mxu0 %v1008_v59 }
 0x86b   : > { %v1695_v26 = vmul.f32 %v3356_v62, %v3348_v46  ;;  %v2225_v46 = vld [vmem:[%s4061_s10 + $0x78] sm:$0xff]  ;;  %v2232_v62 = vld [vmem:[%s4061_s10 + $0xb0] sm:$0xff] }
 0x86c   : > { %v1976_v11 = vpop.xlane.xlu1 %1975  ;;  %v3132_v47 = vpack.c.bf16 %v2225_v46, %v2223_v45  ;;  %v2344_v45 = vld [vmem:[%s4107_s20 + $0x48] sm:$0xff]  ;;  %v2361_v46 = vld [vmem:[%s4107_s20 + $0xd0] sm:$0xff] }
 0x86d   : > { %2989 = vmatprep.mubr.msk.f32.mxu0 %vm1108_vm4, %v1695_v26  ;;  %3357 = vrcp.f32 %v1976_v11  ;;  %v3142_v26 = vpack.c.bf16 %v2232_v62, %v2230_v61  ;;  %v2237_v11 = vld [vmem:[%s4061_s10 + $0xd8] sm:$0xff] }
 0x86e   : > { %2990 = vmatmul.mubr.msk.f32.vlgmr.msra.gmra.mrb[8].mxu0 %vm1108_vm4, %v1696_v1  ;;  %3359 = vrcp.f32 %v1979_v60  ;;  %v2235_v1 = vld [vmem:[%s4061_s10 + $0xc8] sm:$0xff] }
 0x86f   : > { %2993 = vmatpush3.msra.mxu0 %v1008_v59  ;;  %v2233_v59 = vld [vmem:[%s4061_s10 + $0xb8] sm:$0xff] }
 0x870   : > { %v3326_v33 = vpop.permute.xlu1 %3325  ;;  %v3140_v60 = vpack.c.bf16 %v2233_v59, %v2231_v58 }
 0x871   : > { %v3328_v2 = vunpack.i.h.bf16 %v3326_v33  ;;  %v3327_v0 = vunpack.i.l.bf16 %v3326_v33  ;;  %v2234_v33 = vld [vmem:[%s4061_s10 + $0xc0] sm:$0xff] }
 0x873   : > { %v3116_v3 = vpack.c.bf16 %v3328_v2, %v3327_v0  ;;  %v3144_v2 = vpack.c.bf16 %v2237_v11, %v2235_v1  ;;  %v2236_v0 = vld [vmem:[%s4061_s10 + $0xd0] sm:$0xff] }
 0x875   : > { %3117 = vmatprep.subr.bf16.mxu0 %v3116_v3 }
 0x877   : > { %v3358_v4 = vpop.eup %3357 }
 0x878   : > { %v3360_v8 = vpop.eup %3359  ;;  %v1982_v10 = vmul.f32 %v3358_v4, %v3352_v32  ;;  %v2241_v4 = vld [vmem:[%s4061_s10 + $0xf8] sm:$0xff] }
 0x879   : > { %v1983_v12 = vmul.f32 %v3360_v8, %v3350_v48  ;;  %v2222_v48 = vld [vmem:[%s4061_s10 + $0x60] sm:$0xff] }
 0x87a   : > { %v3134_v32 = vpack.c.bf16 %v2224_v49, %v2222_v48  ;;  %v2238_v8 = vld [vmem:[%s4061_s10 + $0xe0] sm:$0xff] }
 0x941   : > { %v2991_v6 = vpop.f32.mrb[8].mxu0 }
 0x942   : > { %v1775_v7 = vpop.f32.mrb[9].mxu0 }
 0x943   : > { %2994 = vmatprep.mubr.msk.f32.mxu0 %vm1010_vm0, %v1775_v7 }
 0x944   : > { %2995 = vmatmul.mubr.msk.f32.vlgmr.msra.gmra.mrb[6].mxu0 %vm1010_vm0, %v2991_v6  ;;  %v3146_v6 = vpack.c.bf16 %v2236_v0, %v2234_v33 }
 0x945   : > { %3119 = vmatpush3.bf16.msra.mxu0 %v3116_v3  ;;  %3008 = vmatprep.mubr.msk.f32.mxu0 %vm1108_vm4, %v1982_v10  ;;  %v2239_v3 = vld [vmem:[%s4061_s10 + $0xe8] sm:$0xff]  ;;  %v2240_v10 = vld [vmem:[%s4061_s10 + $0xf0] sm:$0xff] }
 0x946   : > { %3011 = vmatprep.subr.mxu0 %v1009_v22  ;;  %v3148_v7 = vpack.c.bf16 %v2241_v4, %v2239_v3 }
 0x948   : > { %3009 = vmatmul.mubr.msk.f32.vlgmr.msra.gmra.mrb[10].mxu0 %vm1108_vm4, %v1983_v12  ;;  %v2351_v12 = vld [vmem:[%s4107_s20 + $0x80] sm:$0xff] }
 0x949   : > { %3012 = vmatpush3.msra.mxu0 %v1009_v22  ;;  %v3150_v22 = vpack.c.bf16 %v2240_v10, %v2238_v8  ;;  %v2792_v8 = vld [vmem:[%s4575_s8] ss:$0 sm:$0xff] }
 0xa1b   : > { %v3010_v13 = vpop.f32.mrb[10].mxu0 }
 0xa1c   : > { %v2062_v14 = vpop.f32.mrb[11].mxu0 }
 0xa1d   : > { %3013 = vmatprep.mubr.msk.f32.mxu0 %vm1010_vm0, %v2062_v14  ;;  %v2335_v14 = vld [vmem:[%s4107_s20] sm:$0xff] }
 0xa1e   : > { %3014 = vmatmul.mubr.msk.f32.vlgmr.msra.gmra.mrb[6].mxu0 %vm1010_vm0, %v3010_v13  ;;  %v2352_v13 = vld [vmem:[%s4107_s20 + $0x88] sm:$0xff]  ;;  %v3154_v20 = vpack.c.bf16 %v2336_v16, %v2335_v14 }
 0xa1f   : > { %v3152_v15 = vpack.c.bf16 %v2352_v13, %v2351_v12 }
 0xa21   : > { %3153 = vmatprep.subr.bf16.mxu0 %v3152_v15 }
 0xa22   : > { %3155 = vmatpush3.bf16.msra.mxu0 %v3154_v20  ;;  %v2348_v20 = vld [vmem:[%s4107_s20 + $0x68] sm:$0xff] }
 0xa23   : > { %3157 = vmatprep.subr.bf16.mxu0 %v3156_v21  ;;  %v3178_v21 = vpack.c.bf16 %v2348_v20, %v2347_v18 }
 0xa26   : > { %3159 = vmatpush3.bf16.msra.mxu0 %v3158_v19 }
 0xa27   : > { %3161 = vmatprep.subr.bf16.mxu0 %v3160_v29  ;;  %v2242_v29 = vld [vmem:[%s4093_s0] sm:$0x3] }
 0xaf1   : > { %v3015_v31 = vpop.f32.mrb[6].mxu0 }
 0xaf2   : > { %v2143_v34 = vpop.f32.mrb[7].mxu0  ;;  %v2162_v36 = vadd.f32 %v3015_v31, %v2791_v30  ;;  %v2340_v31 = vld [vmem:[%s4107_s20 + $0x28] sm:$0xff] }
 0xaf3   : > { %v2161_v35 = vadd.f32 %v2791_v30, %v2143_v34  ;;  %v2339_v30 = vld [vmem:[%s4107_s20 + $0x20] sm:$0xff]  ;;  %v2357_v34 = vld [vmem:[%s4107_s20 + $0xb0] sm:$0xff] }
 0xaf4   : > { %v4345_v40 = vadd.f32 %v2162_v36, %v4149_v52  ;;  %v3130_v52 = vpack.c.bf16 %v2220_v44, %v2218_v41  ;;  %v3162_v36 = vpack.c.bf16 %v2340_v31, %v2339_v30  ;;  %v2247_v30 = vrot.slane %v2242_v29, %v4161_v63 }
 0xaf5   : > { %v4339_v38 = vadd.f32 %v2161_v35, %v4130_v28  ;;  %v2219_v28 = vld [vmem:[%s4061_s10 + $0x48] sm:$0xff]  ;;  %v2358_v35 = vld [vmem:[%s4107_s20 + $0xb8] sm:$0xff] }
 0xaf6   : > { %v2173_v42 = vmul.f32 %v4345_v40, %v4345_v40  ;;  %v3128_v43 = vpack.c.bf16 %v2221_v39, %v2219_v28  ;;  %v2342_v28 = vld [vmem:[%s4107_s20 + $0x38] sm:$0xff]  ;;  %v2359_v39 = vld [vmem:[%s4107_s20 + $0xc0] sm:$0xff]  ;;  %3163 = vmatpush3.bf16.msra.mxu0 %v3162_v36 }
 0xaf7   : > { %2165 = vadd.xlane.f32.xlu0 %v4339_v38  ;;  %v2172_v37 = vmul.f32 %v4339_v38, %v4339_v38 }
 0xaf8   : > { %3129 = vmatprep.subr.bf16.mxu1 %v3128_v43  ;;  %v2360_v43 = vld [vmem:[%s4107_s20 + $0xc8] sm:$0xff] }
 0xaf9   : > { %2174 = vadd.xlane.f32.xlu1 %v2172_v37  ;;  %3131 = vmatpush1.bf16.msra.mxu1 %v3130_v52  ;;  %v3164_v37 = vpack.c.bf16 %v2358_v35, %v2357_v34  ;;  %v3168_v44 = vpack.c.bf16 %v2360_v43, %v2359_v39  ;;  %v2343_v52 = vld [vmem:[%s4107_s20 + $0x40] sm:$0xff] }
 0xafa   : > { %3133 = vmatprep.subr.bf16.mxu1 %v3132_v47  ;;  %v2362_v47 = vld [vmem:[%s4107_s20 + $0xd8] sm:$0xff]  ;;  %v3170_v48 = vpack.c.bf16 %v2344_v45, %v2343_v52 }
 0xafb   : > { %2167 = vadd.xlane.f32.xlu0 %v4345_v40  ;;  %3165 = vmatprep.subr.bf16.mxu0 %v3164_v37  ;;  %v3172_v49 = vpack.c.bf16 %v2362_v47, %v2361_v46 }
 0xafd   : > { %3135 = vmatpush1.bf16.msra.mxu1 %v3134_v32  ;;  %v2345_v32 = vld [vmem:[%s4107_s20 + $0x50] sm:$0xff] }
 0xafe   : > { %3137 = vmatprep.subr.bf16.mxu1 %v3136_v53  ;;  %v2364_v53 = vld [vmem:[%s4107_s20 + $0xe8] sm:$0xff]  ;;  %v3174_v55 = vpack.c.bf16 %v2346_v50, %v2345_v32 }
 0xaff   : > { %2176 = vadd.xlane.f32.xlu0 %v2173_v42  ;;  %v2341_v42 = vld [vmem:[%s4107_s20 + $0x30] sm:$0xff]  ;;  %v3176_v56 = vpack.c.bf16 %v2364_v53, %v2363_v51 }
 0xb00   : > { %v3166_v41 = vpack.c.bf16 %v2342_v28, %v2341_v42 }
 0xb01   : > { %3139 = vmatpush1.bf16.msra.mxu1 %v3138_v57 }
 0xb02   : > { %3141 = vmatprep.subr.bf16.mxu1 %v3140_v60  ;;  %3167 = vmatpush3.bf16.msra.mxu0 %v3166_v41 }
 0xb03   : > { %3169 = vmatprep.subr.bf16.mxu0 %v3168_v44 }
 0xb05   : > { %3143 = vmatpush1.bf16.msra.mxu1 %v3142_v26 }
 0xb06   : > { %3145 = vmatprep.subr.bf16.mxu1 %v3144_v2  ;;  %3171 = vmatpush3.bf16.msra.mxu0 %v3170_v48 }
 0xb07   : > { %3173 = vmatprep.subr.bf16.mxu0 %v3172_v49 }
 0xb09   : > { %3147 = vmatpush1.bf16.msra.mxu1 %v3146_v6 }
 0xb0a   : > { %3149 = vmatprep.subr.bf16.mxu1 %v3148_v7  ;;  %3175 = vmatpush3.bf16.msra.mxu0 %v3174_v55 }
 0xb0b   : > { %3177 = vmatprep.subr.bf16.mxu0 %v3176_v56 }
 0xb0d   : > { %3151 = vmatpush1.bf16.msra.mxu1 %v3150_v22  ;;  %v2793_v22 = vld [vmem:[%s4577_s26] ss:$0 sm:$0xff] }
 0xb0e   : > { %3179 = vmatpush3.bf16.msra.mxu0 %v3178_v21 }
 0xb0f   : > { %3181 = vmatprep.subr.bf16.mxu0 %v3180_v25 }
 0xb84   : > { %v2166_v57 = vpop.xlane.xlu0 %2165 }
 0xb85   : > { %v2170_v58 = vmul.f32 0.0078125, %v2166_v57 }
 0xb86   : > { %v2175_v59 = vpop.xlane.xlu1 %2174 }
 0xb87   : > { %v2180_v60 = vmul.f32 %v2170_v58, %v2170_v58  ;;  %v2178_v61 = vmul.f32 0.0078125, %v2175_v59  ;;  %v2184_v6 = vsub.f32 %v4339_v38, %v2170_v58 }
 0xb88   : > { %v2168_v62 = vpop.xlane.xlu0 %2167 }
 0xb89   : > { %v2182_v26 = vsub.f32 %v2178_v61, %v2180_v60  ;;  %v2171_v1 = vmul.f32 0.0078125, %v2168_v62 }
 0xb8b   : > { %v2186_v11 = vadd.f32 1e-05, %v2182_v26  ;;  %v2181_v2 = vmul.f32 %v2171_v1, %v2171_v1  ;;  %v2185_v13 = vsub.f32 %v4345_v40, %v2171_v1  ;;  %v2349_v40 = vld [vmem:[%s4107_s20 + $0x70] sm:$0xff] }
 0xb8c   : > { %v2177_v33 = vpop.xlane.xlu0 %2176  ;;  %v3182_v19 = vpack.c.bf16 %v2350_v27, %v2349_v40 }
 0xb8d   : > { %3361 = vrsqrt.f32 %v2186_v11  ;;  %v2179_v0 = vmul.f32 0.0078125, %v2177_v33 }
 0xb8e   : > { %3183 = vmatpush3.bf16.msra.mxu0 %v3182_v19 }
 0xb8f   : > { %v2183_v3 = vsub.f32 %v2179_v0, %v2181_v2 }
 0xb91   : > { %v2187_v4 = vadd.f32 1e-05, %v2183_v3 }
 0xb93   : > { %3363 = vrsqrt.f32 %v2187_v4 }
 0xb97   : > { %v3362_v7 = vpop.eup %3361 }
 0xb98   : > { %v2190_v10 = vmul.f32 %v3362_v7, %v2184_v6  ;;  %v2795_v7 = vld [vmem:[%s771_s23] ss:$0 sm:$0xff] }
 0xb9a   : > { %v2199_v12 = vmul.f32 %v2792_v8, %v2190_v10 }
 0xb9c   : > { %v2208_v38 = vadd.f32 %v2793_v22, %v2199_v12  ;;  %v2796_v12 = vld [vmem:[%s774_s15] ss:$0 sm:$0xff] }
 0xb9d   : > { %v3364_v14 = vpop.eup %3363 }
 0xb9e   : > { %2319 = vmatmul.mubr.f32.vlgmr.msra.gmra.mrb[12].mxu1 %v2208_v38  ;;  %v2191_v15 = vmul.f32 %v3364_v14, %v2185_v13 }
 0xb9f   : > { %2324 = vmatprep.mubr.f32.mxu1 %v3664_v9  ;;  %v2251_v9 = vrot.slane %v2242_v29, %v845_v5 }
 0xba0   : > { %v2200_v16 = vmul.f32 %v2792_v8, %v2191_v15 }
 0xba2   : > { %v2209_v17 = vadd.f32 %v2793_v22, %v2200_v16 }
 0xba4   : > { %2325 = vmatmul.mubr.f32.gmra.mrb[14].mxu1 %v2209_v17 }
 0xc71   : > { %v2320_v31 = vpop.f32.mrb[12].mxu1 }
 0xc72   : > { %v2321_v34 = vadd.f32 %v2320_v31, %v2247_v30  ;;  %v2322_v35 = vpop.f32.mrb[13].mxu1 }
 0xc73   : > { %v2323_v36 = vadd.f32 %v2322_v35, %v2251_v9 }
 0xc74   : > { %v2331_v42 = vmax.f32 %v2321_v34, 0.0 }
 0xc75   : > { %v2332_v37 = vmax.f32 %v2323_v36, 0.0 }
 0xc77   : > { %v2326_v28 = vpop.f32.mrb[14].mxu1  ;;  %2438 = vmatprep.mubr.f32.mxu0 %v2332_v37 }
 0xc78   : > { %v2327_v39 = vadd.f32 %v2326_v28, %v2247_v30  ;;  %v2328_v43 = vpop.f32.mrb[15].mxu1  ;;  %2439 = vmatmul.mubr.f32.vlgmr.msra.gmra.mrb[12].mxu0 %v2331_v42 }
 0xc79   : > { %v2329_v41 = vadd.f32 %v2328_v43, %v2251_v9 }
 0xc7a   : > { %v2333_v52 = vmax.f32 %v2327_v39, 0.0 }
 0xc7b   : > { %v2334_v44 = vmax.f32 %v2329_v41, 0.0 }
 0xc7d   : > { %2443 = vmatprep.mubr.f32.mxu0 %v2334_v44 }
 0xc7e   : > { %2444 = vmatmul.mubr.f32.gmra.mrb[14].mxu0 %v2333_v52 }
 0xd4b   : > { %v2899_v63 = vpop.f32.mrb[12].mxu0 }
 0xd4c   : > { %v2900_v5 = vpop.f32.mrb[13].mxu0 }
 0xd4d   : > { %v2901_v45 = vadd.f32 %v2900_v5, %v2899_v63 }
 0xd4f   : > { %v2441_v46 = vadd.f32 %v2901_v45, %v2794_v54 }
 0xd51   : > { %v2902_v47 = vpop.f32.mrb[14].mxu0  ;;  %v2449_v48 = vadd.f32 %v2441_v46, %v2208_v38 }
 0xd52   : > { %v2903_v49 = vpop.f32.mrb[15].mxu0 }
 0xd53   : > { %v2904_v32 = vadd.f32 %v2903_v49, %v2902_v47  ;;  %2451 = vadd.xlane.f32.xlu0 %v2449_v48  ;;  %v2457_v55 = vmul.f32 %v2449_v48, %v2449_v48 }
 0xd55   : > { %v2446_v50 = vadd.f32 %v2904_v32, %v2794_v54 }
 0xd57   : > { %v2450_v51 = vadd.f32 %v2446_v50, %v2209_v17 }
 0xd59   : > { %2453 = vadd.xlane.f32.xlu0 %v2450_v51  ;;  %v2458_v53 = vmul.f32 %v2450_v51, %v2450_v51 }
 0xd5b   : > { %2461 = vadd.xlane.f32.xlu1 %v2458_v53 }
 0xd5d   : > { %2459 = vadd.xlane.f32.xlu0 %v2457_v55 }
 0xde0   : > { %v2452_v56 = vpop.xlane.xlu0 %2451 }
 0xde1   : > { %v2455_v58 = vmul.f32 0.0078125, %v2452_v56 }
 0xde3   : > { %v2465_v1 = vmul.f32 %v2455_v58, %v2455_v58  ;;  %v2469_v8 = vsub.f32 %v2449_v48, %v2455_v58 }
 0xde6   : > { %v2454_v57 = vpop.xlane.xlu0 %2453 }
 0xde7   : > { %v2456_v59 = vmul.f32 0.0078125, %v2454_v57 }
 0xde8   : > { %v2462_v60 = vpop.xlane.xlu1 %2461 }
 0xde9   : > { %v2466_v61 = vmul.f32 %v2456_v59, %v2456_v59  ;;  %v2464_v62 = vmul.f32 0.0078125, %v2462_v60  ;;  %v2470_v4 = vsub.f32 %v2450_v51, %v2456_v59 }
 0xdea   : > { %v2460_v26 = vpop.xlane.xlu0 %2459 }
 0xdeb   : > { %v2468_v11 = vsub.f32 %v2464_v62, %v2466_v61  ;;  %v2463_v33 = vmul.f32 0.0078125, %v2460_v26 }
 0xded   : > { %v2472_v2 = vadd.f32 1e-05, %v2468_v11  ;;  %v2467_v0 = vsub.f32 %v2463_v33, %v2465_v1 }
 0xdef   : > { %3365 = vrsqrt.f32 %v2472_v2  ;;  %v2471_v3 = vadd.f32 1e-05, %v2467_v0 }
 0xdf1   : > { %3367 = vrsqrt.f32 %v2471_v3 }
 0xdf9   : > { %v3366_v6 = vpop.eup %3365 }
 0xdfa   : > { %v2476_v10 = vmul.f32 %v3366_v6, %v2470_v4 }
 0xdfb   : > { %v3368_v22 = vpop.eup %3367 }
 0xdfc   : > { %v2485_v13 = vmul.f32 %v2795_v7, %v2476_v10  ;;  %v2475_v38 = vmul.f32 %v3368_v22, %v2469_v8  ;;  %2500 = sbr.rel (%p2797_p8) target bundleno = 3587 (0xe03), region = 116 }
 0xdfe   : > { %v2494_v14 = vadd.f32 %v2796_v12, %v2485_v13  ;;  %v2484_v15 = vmul.f32 %v2795_v7, %v2475_v38 }
 0xe00   : > { %2496 = vst [vmem:[#allocation2 + $0x8] sm:$0xff] %v2494_v14  ;;  %v2493_v16 = vadd.f32 %v2796_v12, %v2484_v15  ;;  %2502 = vst [vmem:[#allocation15 + $0x8] sm:$0xff] (!%p2797_p8), %v2494_v14 }
 0xe02   : > { %2495 = vst [vmem:[#allocation2] sm:$0xff] %v2493_v16  ;;  %2501 = vst [vmem:[#allocation15] sm:$0xff] (!%p2797_p8), %v2493_v16 }
 0xe03 PF: > { %p3248_p0 = scmp.eq.s32.totalorder %s3771_s22, 1  ;;  %s3669_s23 = smov [#allocation15]  }
 0xe04   : > { %s2509_s20 = sshll.u32 %s3669_s23, 4  ;;  %s2510_s20 = int_to_ptr.vmem [resolvable:$true] %s2509_s20 }
 0xe05   : > { %s3573_s27 = scalar_lea.vmem %s2510_s20, 256  ;;  %p3580_p3 = scmp.lt.s32.totalorder %s2510_s20, %s2510_s20 }
 0xe06   : > { %p3574_p5 = scmp.ne.s32.totalorder %s2510_s20, %s3573_s27  ;;  %p3581_p11 = scmp.lt.s32.totalorder %s3573_s27, %s3573_s27 }
 0xe08   : > { %p3575_p9 = pnand %p3574_p5, %p3248_p0  ;;  %p3582_p13 = por %p3581_p11, %p3580_p3 }
 0xe0a   : > { %p3576_p2 = pneg %p3575_p9 }
 0xe0c   : > { %p3583_p12 = pnand %p3582_p13, %p3576_p2 }
 0xe0e   : > { %3586 = shalt.err (!%p3583_p12)
}
 0xe0f   : > { %s4581_s16 = sld [smem:[#allocation38_spill]] }
 0xe15   : > { %s3587_s14 = scalar_lea.hbm %s4581_s16, 256 }
 0xe16   : > { %p3588_p1 = scmp.ne.s32.totalorder %s4581_s16, %s3587_s14  ;;  %p3593_p7 = scmp.lt.u32.totalorder %s3587_s14, %s4581_s16 }
 0xe18   : > { %p3589_p6 = pnand %p3588_p1, %p3248_p0 }
 0xe1a   : > { %p3590_p4 = pneg %p3589_p6 }
 0xe1c   : > { %p3595_p10 = pnand %p3593_p7, %p3590_p4 }
 0xe1e   : > { %3598 = shalt.err (!%p3595_p10)
}
 0xe1f   : > { %s3670_s19 = smov 128   ;;  %s3671_s21 = smov 8  }
 0xe20   : > { %3215 = dma.vmem_to_hbm [thread:$0]  (%p3248_p0), %s2510_s20, 256, %s4581_s16, [#allocation5], %s3670_s19, %s3670_s19, %s3671_s21  }
 0xe21   : > { %3632 = dma.done.wait (%p3248_p0), [#allocation5], 256  }
 0xe22   : > { %3634 = vsyncadd (%p3248_p0), [#allocation5], 4294967040 }
 0xe23 PF: > { %s4582_s21 = sld [smem:[#allocation23_spill]]  ;;  %s4583_s18 = sld [smem:[#allocation21_spill]] }
 0xe24   : > { %s4584_s19 = sld [smem:[#allocation22_spill]]  ;;  %s4585_s20 = sld [smem:[#allocation24_spill]] }
 0xe29   : > { %p31_p8 = scmp.ge.s32.totalorder %s4582_s21, 4  }
 0xe2b   :  { %33 = sbr.rel (!%p31_p8) target bundleno = 22 (0x16), region = 197 }
 0xe32   :  { %2525 = vsyncpa [#allocation4], 1 }
 0xe33   :  { %2527 = vsyncpa [#allocation4 + $0x1], 1 }
 0xe34   :  { %2528 = vsyncpa [#allocation7], 1 }
 0xe35   :  { %2529 = vsyncpa [#allocation10], 1 }
 0xe36   :  { %2531 = vsyncpa [#allocation10 + $0x1], 1 }
 0xe37   :  { %2532 = vsyncpa [#allocation13], 1 }
 0xe38   :  { %2534 = vsyncpa [#allocation13 + $0x1], 1 }
 0xe39   :  { %2535 = vsyncpa [#allocation5], 1 }
 0xe3a   :  { %2537 = vsyncpa [#allocation5 + $0x1], 1 }

</bundles_post_ra>
